<compile_context>
chip_gen: v5e
topology: v5e:2x2
jax: 0.10.0
libtpu: 0.0.40
codegen_flags: <defaults>
</compile_context>

<pallas_src>
import functools
import math

import jax
import jax.numpy as jnp
import numpy as np
from jax import lax
from jax.experimental import pallas as pl
from jax.experimental.pallas import tpu as pltpu


# ----------------------------------------------------------------------------
# Kernel: one batch-tile (bb, S, E) per grid step; full block fused in VMEM.
# ----------------------------------------------------------------------------
def _attn_block_kernel(num_heads, eps, mxu_dtype, approx_softmax,
                       x_ref,
                       wqkv_ref, bqkv_ref,    # (E, 3E), (1, 3E)   pre-transposed in-proj
                       wout_ref, bout_ref,    # (E, E),  (1, E)    pre-transposed out-proj
                       g1_ref, be1_ref,       # (S, E) LayerNorm1 affine
                       w1_ref, b1_ref,        # (E, 4E), (1, 4E)   pre-transposed FF lin1
                       w2_ref, b2_ref,        # (4E, E), (1, E)    pre-transposed FF lin2
                       g2_ref, be2_ref,       # (S, E) LayerNorm2 affine
                       o_ref):
    bb, S, E = x_ref.shape
    H = num_heads
    Dh = E // H
    R = bb * S
    scale = 1.0 / math.sqrt(Dh)

    def mm(a, w_ref_):
        w = w_ref_[...]
        if w.dtype != a.dtype:
            a = a.astype(w.dtype)
        return jnp.dot(a, w, preferred_element_type=jnp.float32)

    cast = (lambda t: t.astype(mxu_dtype)) if mxu_dtype is not None else (lambda t: t)

    x3 = x_ref[...].astype(jnp.float32)            # (bb, S, E)
    xf = x3.reshape(R, E)                          # fold batch into matmul rows

    # ---- QKV projection: one (R, E) x (E, 3E) matmul -------------------------
    qkv = mm(xf, wqkv_ref) + bqkv_ref[...]         # (R, 3E), bias broadcast once
    q = qkv[:, 0 * E:1 * E] * scale                # scale applied once to the q slab
    k = qkv[:, 1 * E:2 * E]
    v = qkv[:, 2 * E:3 * E]

    # ---- Heads folded into the contraction batch dim -------------------------
    # (R, E) -> (H*bb, S, Dh) via static lane slices + leading-dim reshapes only.
    def to_heads(t):
        return jnp.concatenate(
            [t[:, h * Dh:(h + 1) * Dh].reshape(bb, S, Dh) for h in range(H)], axis=0)

    qh, kh, vh = to_heads(q), to_heads(k), to_heads(v)      # each (H*bb, S, Dh)

    # Two batched contractions replace 2*H*bb micro-matmuls.
    s = jnp.einsum('bqd,bkd->bqk', cast(qh), cast(kh),
                   preferred_element_type=jnp.float32)       # (H*bb, S, S)
    m = jnp.max(s, axis=-1, keepdims=True)
    p = jnp.exp(s - m)
    den = jnp.sum(p, axis=-1, keepdims=True)
    if approx_softmax:
        p = p * pl.reciprocal(den, approx=True)              # EUP, frees VALU slots
    else:
        p = p / den
    oh = jnp.einsum('bqk,bkd->bqd', cast(p), cast(vh),
                    preferred_element_type=jnp.float32)      # (H*bb, S, Dh)

    # (H*bb, S, Dh) -> (R, E): static major-axis slices + one lane concatenate.
    attn = jnp.concatenate(
        [oh[h * bb:(h + 1) * bb].reshape(R, Dh) for h in range(H)], axis=-1)
    attn = mm(attn, wout_ref) + bout_ref[...]                # (R, E)

    # ---- LayerNorm over the whole (S, E) slab per batch element --------------
    def slab_ln(t, g, b):                                    # t: (bb, S, E)
        n = float(S * E)
        tot = jnp.sum(jnp.sum(t, axis=2, keepdims=True), axis=1, keepdims=True)
        mu = tot / n
        d = t - mu
        var = jnp.sum(jnp.sum(d * d, axis=2, keepdims=True), axis=1, keepdims=True) / n
        return d * lax.rsqrt(var + eps) * g + b

    x1 = x3 + attn.reshape(bb, S, E)
    x1n = slab_ln(x1, g1_ref[...], be1_ref[...])

    # ---- Feed-forward: Linear -> exact GELU -> Linear -------------------------
    h1 = mm(x1n.reshape(R, E), w1_ref) + b1_ref[...]         # (R, 4E)
    h1 = 0.5 * h1 * (1.0 + lax.erf(h1 * (1.0 / math.sqrt(2.0))))   # exact erf GELU
    ff = mm(h1, w2_ref) + b2_ref[...]                        # (R, E)

    x2 = x1n + ff.reshape(bb, S, E)
    x2n = slab_ln(x2, g2_ref[...], be2_ref[...])

    o_ref[...] = x2n.astype(o_ref.dtype)


# ----------------------------------------------------------------------------
# Wrapper
# ----------------------------------------------------------------------------
def _full_spec(shape):
    nd = len(shape)
    return pl.BlockSpec(shape, lambda i, nd=nd: (0,) * nd)


def attentional_block(x, params, *, num_heads, eps=1e-5, batch_block=None,
                      mxu_dtype=None, approx_softmax=True):
    B, S, E = x.shape
    Eff = params["w1"].shape[0]                 # linearScaling * E

    # Batch tile: aim for ~128 matmul rows per grid step (amortize per-step overhead);
    # must divide B.  Remaining grid steps are marked "parallel" (megacore / 2-TC v7x).
    if batch_block is None:
        bb = min(B, max(1, 128 // max(S, 1)))
        while B % bb:
            bb -= 1
    else:
        bb = batch_block
        assert B % bb == 0
    nb = B // bb

    # Host-side (outside-kernel) weight pre-transposes: in-kernel dots need no .T.
    wqkv_t = params["in_w"].T                   # (E, 3E)
    wout_t = params["out_w"].T                  # (E, E)
    w1_t = params["w1"].T                       # (E, 4E)
    w2_t = params["w2"].T                       # (4E, E)
    if mxu_dtype is not None:                   # halve weight DMA bytes on v6e/v7x
        wqkv_t, wout_t, w1_t, w2_t = (w.astype(mxu_dtype)
                                      for w in (wqkv_t, wout_t, w1_t, w2_t))

    kernel = functools.partial(_attn_block_kernel, num_heads, eps,
                               mxu_dtype, approx_softmax)

    grid_spec = pltpu.PrefetchScalarGridSpec(
        num_scalar_prefetch=0,
        grid=(nb,),
        in_specs=[
            pl.BlockSpec((bb, S, E), lambda i: (i, 0, 0)),   # x (batch tile)
            _full_spec((E, 3 * E)),                          # Wqkv^T
            _full_spec((1, 3 * E)),                          # bqkv
            _full_spec((E, E)),                              # Wout^T
            _full_spec((1, E)),                              # bout
            _full_spec((S, E)),                              # norm1 weight
            _full_spec((S, E)),                              # norm1 bias
            _full_spec((E, Eff)),                            # W1^T
            _full_spec((1, Eff)),                            # b1
            _full_spec((Eff, E)),                            # W2^T
            _full_spec((1, E)),                              # b2
            _full_spec((S, E)),                              # norm2 weight
            _full_spec((S, E)),                              # norm2 bias
        ],
        out_specs=pl.BlockSpec((bb, S, E), lambda i: (i, 0, 0)),
    )

    return pl.pallas_call(
        kernel,
        out_shape=jax.ShapeDtypeStruct((B, S, E), x.dtype),
        grid_spec=grid_spec,
        compiler_params=pltpu.CompilerParams(dimension_semantics=("parallel",)),
    )(x, wqkv_t, params["in_b"], wout_t, params["out_b"],
      params["g1"], params["be1"], w1_t, params["b1"], w2_t, params["b2"],
      params["g2"], params["be2"])


# ----------------------------------------------------------------------------
# Pure-JAX reference (mirrors the PyTorch module; HIGHEST matmul precision)
# ----------------------------------------------------------------------------
def reference(x, params, *, num_heads, eps=1e-5):
    B, S, E = x.shape
    H = num_heads
    Dh = E // H
    hp = lax.Precision.HIGHEST
    qkv = jnp.einsum("bse,fe->bsf", x, params["in_w"], precision=hp) + params["in_b"][0]
    q, k, v = jnp.split(qkv, 3, axis=-1)

    def heads(t):  # (B,S,E) -> (B,H,S,Dh)
        return t.reshape(B, S, H, Dh).transpose(0, 2, 1, 3)

    qh, kh, vh = heads(q) / math.sqrt(Dh), heads(k), heads(v)
    s = jnp.einsum("bhqd,bhkd->bhqk", qh, kh, precision=hp)
    p = jax.nn.softmax(s, axis=-1)
    o = jnp.einsum("bhqk,bhkd->bhqd", p, vh,
                   precision=hp).transpose(0, 2, 1, 3).reshape(B, S, E)
    attn = jnp.einsum("bse,fe->bsf", o, params["out_w"], precision=hp) + params["out_b"][0]

    def ln(t, g, b):  # LayerNorm over the whole (S, E) slab per batch element
        mu = jnp.mean(t, axis=(1, 2), keepdims=True)
        var = jnp.mean((t - mu) ** 2, axis=(1, 2), keepdims=True)
        return (t - mu) * lax.rsqrt(var + eps) * g + b

    x1 = ln(x + attn, params["g1"], params["be1"])
    h1 = jnp.einsum("bse,fe->bsf", x1, params["w1"], precision=hp) + params["b1"][0]
    h1 = 0.5 * h1 * (1.0 + lax.erf(h1 / math.sqrt(2.0)))
    ff = jnp.einsum("bsf,ef->bse", h1, params["w2"], precision=hp) + params["b2"][0]
    return ln(x1 + ff, params["g2"], params["be2"])


# ----------------------------------------------------------------------------
# Main
# ----------------------------------------------------------------------------
if __name__ == "__main__":
    # Small config consistent with the module: numPatches=S, embedDim=E, numHeads=H.
    # E=128 keeps the output block lane-dense (E is a multiple of 128 lanes).
    B, S, E, H, LS = 2, 8, 128, 8, 4
    key = jax.random.PRNGKey(0)
    ks = jax.random.split(key, 12)

    def rnd(k, shape, scale=0.05):
        return (scale * jax.random.normal(k, shape)).astype(jnp.float32)

    params = {
        "in_w":  rnd(ks[0], (3 * E, E)),
        "in_b":  rnd(ks[1], (1, 3 * E)),
        "out_w": rnd(ks[2], (E, E)),
        "out_b": rnd(ks[3], (1, E)),
        "g1":    (1.0 + rnd(ks[4], (S, E), 0.1)).astype(jnp.float32),
        "be1":   rnd(ks[5], (S, E)),
        "w1":    rnd(ks[6], (LS * E, E)),
        "b1":    rnd(ks[7], (1, LS * E)),
        "w2":    rnd(ks[8], (E, LS * E)),
        "b2":    rnd(ks[9], (1, E)),
        "g2":    (1.0 + rnd(ks[10], (S, E), 0.1)).astype(jnp.float32),
        "be2":   rnd(ks[11], (S, E)),
    }

    x = (1.0 * jax.random.normal(jax.random.PRNGKey(1), (B, S, E))).astype(jnp.float32)

    out = attentional_block(x, params, num_heads=H)   # f32 MXU operands, approx softmax recip
    out = jax.block_until_ready(out)

    ref = reference(x, params, num_heads=H)
    # Tolerance covers the EUP approximate reciprocal in the softmax normalization
    # (and MXU pass-precision differences); set approx_softmax=False for ~1e-5 parity.
    np.testing.assert_allclose(np.asarray(out), np.asarray(ref), rtol=5e-3, atol=5e-3)

    print("KERNEL_OK")
</pallas_src>

<mosaic_0001>
module attributes {stable_mosaic.version = 11 : i64} {
  func.func @_attn_block_kernel(%arg0: i32, %arg1: memref<2x8x128xf32, #tpu.memory_space<vmem>>, %arg2: memref<128x384xf32, #tpu.memory_space<vmem>>, %arg3: memref<1x384xf32, #tpu.memory_space<vmem>>, %arg4: memref<128x128xf32, #tpu.memory_space<vmem>>, %arg5: memref<1x128xf32, #tpu.memory_space<vmem>>, %arg6: memref<8x128xf32, #tpu.memory_space<vmem>>, %arg7: memref<8x128xf32, #tpu.memory_space<vmem>>, %arg8: memref<128x512xf32, #tpu.memory_space<vmem>>, %arg9: memref<1x512xf32, #tpu.memory_space<vmem>>, %arg10: memref<512x128xf32, #tpu.memory_space<vmem>>, %arg11: memref<1x128xf32, #tpu.memory_space<vmem>>, %arg12: memref<8x128xf32, #tpu.memory_space<vmem>>, %arg13: memref<8x128xf32, #tpu.memory_space<vmem>>, %arg14: memref<2x8x128xf32, #tpu.memory_space<vmem>>) attributes {dimension_semantics = [#tpu.dimension_semantics<parallel>], iteration_bounds = array<i64: 1>, scalar_prefetch = 0 : i64, scratch_operands = 0 : i64, tpu.core_type = #tpu.core_type<tc>, window_params = [{transform_indices = @transform_0, window_bounds = array<i64: 2, 8, 128>}, {pipeline_mode = #tpu.pipeline_mode<synchronous>, transform_indices = @transform_1, window_bounds = array<i64: 128, 384>}, {pipeline_mode = #tpu.pipeline_mode<synchronous>, transform_indices = @transform_2, window_bounds = array<i64: 1, 384>}, {pipeline_mode = #tpu.pipeline_mode<synchronous>, transform_indices = @transform_3, window_bounds = array<i64: 128, 128>}, {pipeline_mode = #tpu.pipeline_mode<synchronous>, transform_indices = @transform_4, window_bounds = array<i64: 1, 128>}, {pipeline_mode = #tpu.pipeline_mode<synchronous>, transform_indices = @transform_5, window_bounds = array<i64: 8, 128>}, {pipeline_mode = #tpu.pipeline_mode<synchronous>, transform_indices = @transform_6, window_bounds = array<i64: 8, 128>}, {pipeline_mode = #tpu.pipeline_mode<synchronous>, transform_indices = @transform_7, window_bounds = array<i64: 128, 512>}, {pipeline_mode = #tpu.pipeline_mode<synchronous>, transform_indices = @transform_8, window_bounds = array<i64: 1, 512>}, {pipeline_mode = #tpu.pipeline_mode<synchronous>, transform_indices = @transform_9, window_bounds = array<i64: 512, 128>}, {pipeline_mode = #tpu.pipeline_mode<synchronous>, transform_indices = @transform_10, window_bounds = array<i64: 1, 128>}, {pipeline_mode = #tpu.pipeline_mode<synchronous>, transform_indices = @transform_11, window_bounds = array<i64: 8, 128>}, {pipeline_mode = #tpu.pipeline_mode<synchronous>, transform_indices = @transform_12, window_bounds = array<i64: 8, 128>}, {transform_indices = @transform_13, window_bounds = array<i64: 2, 8, 128>}]} {
    %c0 = arith.constant 0 : index
    %c0_0 = arith.constant 0 : index
    %c0_1 = arith.constant 0 : index
    %0 = vector.load %arg1[%c0, %c0_0, %c0_1] : memref<2x8x128xf32, #tpu.memory_space<vmem>>, vector<2x8x128xf32>
    %1 = vector.shape_cast %0 : vector<2x8x128xf32> to vector<16x128xf32>
    %c0_2 = arith.constant 0 : index
    %c0_3 = arith.constant 0 : index
    %2 = vector.load %arg2[%c0_2, %c0_3] : memref<128x384xf32, #tpu.memory_space<vmem>>, vector<128x384xf32>
    %cst = arith.constant dense<0.000000e+00> : vector<16x384xf32>
    %3 = tpu.matmul %1, %2, %cst {dimension_numbers = #tpu.dot_dimension_numbers<[1], [0], [0], [1], [0, 0, 1, 1], [], []>} : vector<16x128xf32>, vector<128x384xf32>, vector<16x384xf32> -> vector<16x384xf32>
    %c0_4 = arith.constant 0 : index
    %c0_5 = arith.constant 0 : index
    %4 = vector.load %arg3[%c0_4, %c0_5] : memref<1x384xf32, #tpu.memory_space<vmem>>, vector<1x384xf32>
    %5 = vector.broadcast %4 : vector<1x384xf32> to vector<16x384xf32>
    %6 = arith.addf %3, %5 : vector<16x384xf32>
    %7 = vector.extract_strided_slice %6 {offsets = [0, 0], sizes = [16, 128], strides = [1, 1]} : vector<16x384xf32> to vector<16x128xf32>
    %cst_6 = arith.constant 2.500000e-01 : f32
    %8 = vector.broadcast %cst_6 : f32 to vector<16x128xf32>
    %9 = arith.mulf %7, %8 : vector<16x128xf32>
    %10 = vector.extract_strided_slice %6 {offsets = [0, 128], sizes = [16, 128], strides = [1, 1]} : vector<16x384xf32> to vector<16x128xf32>
    %11 = vector.extract_strided_slice %6 {offsets = [0, 256], sizes = [16, 128], strides = [1, 1]} : vector<16x384xf32> to vector<16x128xf32>
    %12 = vector.extract_strided_slice %9 {offsets = [0, 0], sizes = [16, 16], strides = [1, 1]} : vector<16x128xf32> to vector<16x16xf32>
    %13 = vector.shape_cast %12 : vector<16x16xf32> to vector<2x8x16xf32>
    %14 = vector.extract_strided_slice %9 {offsets = [0, 16], sizes = [16, 16], strides = [1, 1]} : vector<16x128xf32> to vector<16x16xf32>
    %15 = vector.shape_cast %14 : vector<16x16xf32> to vector<2x8x16xf32>
    %16 = vector.extract_strided_slice %9 {offsets = [0, 32], sizes = [16, 16], strides = [1, 1]} : vector<16x128xf32> to vector<16x16xf32>
    %17 = vector.shape_cast %16 : vector<16x16xf32> to vector<2x8x16xf32>
    %18 = vector.extract_strided_slice %9 {offsets = [0, 48], sizes = [16, 16], strides = [1, 1]} : vector<16x128xf32> to vector<16x16xf32>
    %19 = vector.shape_cast %18 : vector<16x16xf32> to vector<2x8x16xf32>
    %20 = vector.extract_strided_slice %9 {offsets = [0, 64], sizes = [16, 16], strides = [1, 1]} : vector<16x128xf32> to vector<16x16xf32>
    %21 = vector.shape_cast %20 : vector<16x16xf32> to vector<2x8x16xf32>
    %22 = vector.extract_strided_slice %9 {offsets = [0, 80], sizes = [16, 16], strides = [1, 1]} : vector<16x128xf32> to vector<16x16xf32>
    %23 = vector.shape_cast %22 : vector<16x16xf32> to vector<2x8x16xf32>
    %24 = vector.extract_strided_slice %9 {offsets = [0, 96], sizes = [16, 16], strides = [1, 1]} : vector<16x128xf32> to vector<16x16xf32>
    %25 = vector.shape_cast %24 : vector<16x16xf32> to vector<2x8x16xf32>
    %26 = vector.extract_strided_slice %9 {offsets = [0, 112], sizes = [16, 16], strides = [1, 1]} : vector<16x128xf32> to vector<16x16xf32>
    %27 = vector.shape_cast %26 : vector<16x16xf32> to vector<2x8x16xf32>
    %28 = tpu.concatenate %13, %15, %17, %19, %21, %23, %25, %27 in 0 : vector<2x8x16xf32>, vector<2x8x16xf32>, vector<2x8x16xf32>, vector<2x8x16xf32>, vector<2x8x16xf32>, vector<2x8x16xf32>, vector<2x8x16xf32>, vector<2x8x16xf32> -> vector<16x8x16xf32>
    %29 = vector.extract_strided_slice %10 {offsets = [0, 0], sizes = [16, 16], strides = [1, 1]} : vector<16x128xf32> to vector<16x16xf32>
    %30 = vector.shape_cast %29 : vector<16x16xf32> to vector<2x8x16xf32>
    %31 = vector.extract_strided_slice %10 {offsets = [0, 16], sizes = [16, 16], strides = [1, 1]} : vector<16x128xf32> to vector<16x16xf32>
    %32 = vector.shape_cast %31 : vector<16x16xf32> to vector<2x8x16xf32>
    %33 = vector.extract_strided_slice %10 {offsets = [0, 32], sizes = [16, 16], strides = [1, 1]} : vector<16x128xf32> to vector<16x16xf32>
    %34 = vector.shape_cast %33 : vector<16x16xf32> to vector<2x8x16xf32>
    %35 = vector.extract_strided_slice %10 {offsets = [0, 48], sizes = [16, 16], strides = [1, 1]} : vector<16x128xf32> to vector<16x16xf32>
    %36 = vector.shape_cast %35 : vector<16x16xf32> to vector<2x8x16xf32>
    %37 = vector.extract_strided_slice %10 {offsets = [0, 64], sizes = [16, 16], strides = [1, 1]} : vector<16x128xf32> to vector<16x16xf32>
    %38 = vector.shape_cast %37 : vector<16x16xf32> to vector<2x8x16xf32>
    %39 = vector.extract_strided_slice %10 {offsets = [0, 80], sizes = [16, 16], strides = [1, 1]} : vector<16x128xf32> to vector<16x16xf32>
    %40 = vector.shape_cast %39 : vector<16x16xf32> to vector<2x8x16xf32>
    %41 = vector.extract_strided_slice %10 {offsets = [0, 96], sizes = [16, 16], strides = [1, 1]} : vector<16x128xf32> to vector<16x16xf32>
    %42 = vector.shape_cast %41 : vector<16x16xf32> to vector<2x8x16xf32>
    %43 = vector.extract_strided_slice %10 {offsets = [0, 112], sizes = [16, 16], strides = [1, 1]} : vector<16x128xf32> to vector<16x16xf32>
    %44 = vector.shape_cast %43 : vector<16x16xf32> to vector<2x8x16xf32>
    %45 = tpu.concatenate %30, %32, %34, %36, %38, %40, %42, %44 in 0 : vector<2x8x16xf32>, vector<2x8x16xf32>, vector<2x8x16xf32>, vector<2x8x16xf32>, vector<2x8x16xf32>, vector<2x8x16xf32>, vector<2x8x16xf32>, vector<2x8x16xf32> -> vector<16x8x16xf32>
    %46 = vector.extract_strided_slice %11 {offsets = [0, 0], sizes = [16, 16], strides = [1, 1]} : vector<16x128xf32> to vector<16x16xf32>
    %47 = vector.shape_cast %46 : vector<16x16xf32> to vector<2x8x16xf32>
    %48 = vector.extract_strided_slice %11 {offsets = [0, 16], sizes = [16, 16], strides = [1, 1]} : vector<16x128xf32> to vector<16x16xf32>
    %49 = vector.shape_cast %48 : vector<16x16xf32> to vector<2x8x16xf32>
    %50 = vector.extract_strided_slice %11 {offsets = [0, 32], sizes = [16, 16], strides = [1, 1]} : vector<16x128xf32> to vector<16x16xf32>
    %51 = vector.shape_cast %50 : vector<16x16xf32> to vector<2x8x16xf32>
    %52 = vector.extract_strided_slice %11 {offsets = [0, 48], sizes = [16, 16], strides = [1, 1]} : vector<16x128xf32> to vector<16x16xf32>
    %53 = vector.shape_cast %52 : vector<16x16xf32> to vector<2x8x16xf32>
    %54 = vector.extract_strided_slice %11 {offsets = [0, 64], sizes = [16, 16], strides = [1, 1]} : vector<16x128xf32> to vector<16x16xf32>
    %55 = vector.shape_cast %54 : vector<16x16xf32> to vector<2x8x16xf32>
    %56 = vector.extract_strided_slice %11 {offsets = [0, 80], sizes = [16, 16], strides = [1, 1]} : vector<16x128xf32> to vector<16x16xf32>
    %57 = vector.shape_cast %56 : vector<16x16xf32> to vector<2x8x16xf32>
    %58 = vector.extract_strided_slice %11 {offsets = [0, 96], sizes = [16, 16], strides = [1, 1]} : vector<16x128xf32> to vector<16x16xf32>
    %59 = vector.shape_cast %58 : vector<16x16xf32> to vector<2x8x16xf32>
    %60 = vector.extract_strided_slice %11 {offsets = [0, 112], sizes = [16, 16], strides = [1, 1]} : vector<16x128xf32> to vector<16x16xf32>
    %61 = vector.shape_cast %60 : vector<16x16xf32> to vector<2x8x16xf32>
    %62 = tpu.concatenate %47, %49, %51, %53, %55, %57, %59, %61 in 0 : vector<2x8x16xf32>, vector<2x8x16xf32>, vector<2x8x16xf32>, vector<2x8x16xf32>, vector<2x8x16xf32>, vector<2x8x16xf32>, vector<2x8x16xf32>, vector<2x8x16xf32> -> vector<16x8x16xf32>
    "tpu.trace_start"() <{level = 10 : i32, message = "bqd,bkd->bqk"}> : () -> ()
    %cst_7 = arith.constant dense<0.000000e+00> : vector<16x8x8xf32>
    %63 = tpu.matmul %28, %45, %cst_7 {dimension_numbers = #tpu.dot_dimension_numbers<[2], [2], [1], [1], [0, 0, 0, 1, 1, 1], [0], [0]>} : vector<16x8x16xf32>, vector<16x8x16xf32>, vector<16x8x8xf32> -> vector<16x8x8xf32>
    "tpu.trace_stop"() : () -> ()
    %cst_8 = arith.constant dense<0xFF800000> : vector<16x8xf32>
    %64 = vector.multi_reduction <maximumf>, %63, %cst_8 [2] : vector<16x8x8xf32> to vector<16x8xf32>
    %65 = vector.shape_cast %64 : vector<16x8xf32> to vector<16x8x1xf32>
    %66 = vector.broadcast %65 : vector<16x8x1xf32> to vector<16x8x8xf32>
    %67 = arith.subf %63, %66 : vector<16x8x8xf32>
    %68 = math.exp %67 : vector<16x8x8xf32>
    %cst_9 = arith.constant dense<0.000000e+00> : vector<16x8xf32>
    %69 = vector.multi_reduction <add>, %68, %cst_9 [2] : vector<16x8x8xf32> to vector<16x8xf32>
    %70 = vector.shape_cast %69 : vector<16x8xf32> to vector<16x8x1xf32>
    %71 = tpu.reciprocal %70 {approx = true} : vector<16x8x1xf32> -> vector<16x8x1xf32>
    %72 = vector.broadcast %71 : vector<16x8x1xf32> to vector<16x8x8xf32>
    %73 = arith.mulf %68, %72 : vector<16x8x8xf32>
    "tpu.trace_start"() <{level = 10 : i32, message = "bqk,bkd->bqd"}> : () -> ()
    %cst_10 = arith.constant dense<0.000000e+00> : vector<16x8x16xf32>
    %74 = tpu.matmul %73, %62, %cst_10 {dimension_numbers = #tpu.dot_dimension_numbers<[2], [1], [1], [2], [0, 0, 0, 1, 1, 2], [0], [0]>} : vector<16x8x8xf32>, vector<16x8x16xf32>, vector<16x8x16xf32> -> vector<16x8x16xf32>
    "tpu.trace_stop"() : () -> ()
    %75 = vector.extract_strided_slice %74 {offsets = [0, 0, 0], sizes = [2, 8, 16], strides = [1, 1, 1]} : vector<16x8x16xf32> to vector<2x8x16xf32>
    %76 = vector.shape_cast %75 : vector<2x8x16xf32> to vector<16x16xf32>
    %77 = vector.extract_strided_slice %74 {offsets = [2, 0, 0], sizes = [2, 8, 16], strides = [1, 1, 1]} : vector<16x8x16xf32> to vector<2x8x16xf32>
    %78 = vector.shape_cast %77 : vector<2x8x16xf32> to vector<16x16xf32>
    %79 = vector.extract_strided_slice %74 {offsets = [4, 0, 0], sizes = [2, 8, 16], strides = [1, 1, 1]} : vector<16x8x16xf32> to vector<2x8x16xf32>
    %80 = vector.shape_cast %79 : vector<2x8x16xf32> to vector<16x16xf32>
    %81 = vector.extract_strided_slice %74 {offsets = [6, 0, 0], sizes = [2, 8, 16], strides = [1, 1, 1]} : vector<16x8x16xf32> to vector<2x8x16xf32>
    %82 = vector.shape_cast %81 : vector<2x8x16xf32> to vector<16x16xf32>
    %83 = vector.extract_strided_slice %74 {offsets = [8, 0, 0], sizes = [2, 8, 16], strides = [1, 1, 1]} : vector<16x8x16xf32> to vector<2x8x16xf32>
    %84 = vector.shape_cast %83 : vector<2x8x16xf32> to vector<16x16xf32>
    %85 = vector.extract_strided_slice %74 {offsets = [10, 0, 0], sizes = [2, 8, 16], strides = [1, 1, 1]} : vector<16x8x16xf32> to vector<2x8x16xf32>
    %86 = vector.shape_cast %85 : vector<2x8x16xf32> to vector<16x16xf32>
    %87 = vector.extract_strided_slice %74 {offsets = [12, 0, 0], sizes = [2, 8, 16], strides = [1, 1, 1]} : vector<16x8x16xf32> to vector<2x8x16xf32>
    %88 = vector.shape_cast %87 : vector<2x8x16xf32> to vector<16x16xf32>
    %89 = vector.extract_strided_slice %74 {offsets = [14, 0, 0], sizes = [2, 8, 16], strides = [1, 1, 1]} : vector<16x8x16xf32> to vector<2x8x16xf32>
    %90 = vector.shape_cast %89 : vector<2x8x16xf32> to vector<16x16xf32>
    %91 = tpu.concatenate %76, %78, %80, %82, %84, %86, %88, %90 in 1 : vector<16x16xf32>, vector<16x16xf32>, vector<16x16xf32>, vector<16x16xf32>, vector<16x16xf32>, vector<16x16xf32>, vector<16x16xf32>, vector<16x16xf32> -> vector<16x128xf32>
    %c0_11 = arith.constant 0 : index
    %c0_12 = arith.constant 0 : index
    %92 = vector.load %arg4[%c0_11, %c0_12] : memref<128x128xf32, #tpu.memory_space<vmem>>, vector<128x128xf32>
    %cst_13 = arith.constant dense<0.000000e+00> : vector<16x128xf32>
    %93 = tpu.matmul %91, %92, %cst_13 {dimension_numbers = #tpu.dot_dimension_numbers<[1], [0], [0], [1], [0, 0, 1, 1], [], []>} : vector<16x128xf32>, vector<128x128xf32>, vector<16x128xf32> -> vector<16x128xf32>
    %c0_14 = arith.constant 0 : index
    %c0_15 = arith.constant 0 : index
    %94 = vector.load %arg5[%c0_14, %c0_15] : memref<1x128xf32, #tpu.memory_space<vmem>>, vector<1x128xf32>
    %95 = vector.broadcast %94 : vector<1x128xf32> to vector<16x128xf32>
    %96 = arith.addf %93, %95 : vector<16x128xf32>
    %97 = vector.shape_cast %96 : vector<16x128xf32> to vector<2x8x128xf32>
    %98 = arith.addf %0, %97 : vector<2x8x128xf32>
    %c0_16 = arith.constant 0 : index
    %c0_17 = arith.constant 0 : index
    %99 = vector.load %arg6[%c0_16, %c0_17] : memref<8x128xf32, #tpu.memory_space<vmem>>, vector<8x128xf32>
    %c0_18 = arith.constant 0 : index
    %c0_19 = arith.constant 0 : index
    %100 = vector.load %arg7[%c0_18, %c0_19] : memref<8x128xf32, #tpu.memory_space<vmem>>, vector<8x128xf32>
    %cst_20 = arith.constant dense<0.000000e+00> : vector<2x8xf32>
    %101 = vector.multi_reduction <add>, %98, %cst_20 [2] : vector<2x8x128xf32> to vector<2x8xf32>
    %102 = vector.shape_cast %101 : vector<2x8xf32> to vector<2x8x1xf32>
    %cst_21 = arith.constant dense<0.000000e+00> : vector<2x1xf32>
    %103 = vector.multi_reduction <add>, %102, %cst_21 [1] : vector<2x8x1xf32> to vector<2x1xf32>
    %104 = vector.shape_cast %103 : vector<2x1xf32> to vector<2x1x1xf32>
    %cst_22 = arith.constant 1.024000e+03 : f32
    %105 = vector.broadcast %cst_22 : f32 to vector<2x1x1xf32>
    %106 = arith.divf %104, %105 : vector<2x1x1xf32>
    %107 = vector.broadcast %106 : vector<2x1x1xf32> to vector<2x8x128xf32>
    %108 = arith.subf %98, %107 : vector<2x8x128xf32>
    %109 = arith.mulf %108, %108 : vector<2x8x128xf32>
    %cst_23 = arith.constant dense<0.000000e+00> : vector<2x8xf32>
    %110 = vector.multi_reduction <add>, %109, %cst_23 [2] : vector<2x8x128xf32> to vector<2x8xf32>
    %111 = vector.shape_cast %110 : vector<2x8xf32> to vector<2x8x1xf32>
    %cst_24 = arith.constant dense<0.000000e+00> : vector<2x1xf32>
    %112 = vector.multi_reduction <add>, %111, %cst_24 [1] : vector<2x8x1xf32> to vector<2x1xf32>
    %113 = vector.shape_cast %112 : vector<2x1xf32> to vector<2x1x1xf32>
    %cst_25 = arith.constant 1.024000e+03 : f32
    %114 = vector.broadcast %cst_25 : f32 to vector<2x1x1xf32>
    %115 = arith.divf %113, %114 : vector<2x1x1xf32>
    %cst_26 = arith.constant 9.99999974E-6 : f32
    %116 = vector.broadcast %cst_26 : f32 to vector<2x1x1xf32>
    %117 = arith.addf %115, %116 : vector<2x1x1xf32>
    %118 = math.rsqrt %117 : vector<2x1x1xf32>
    %119 = vector.broadcast %118 : vector<2x1x1xf32> to vector<2x8x128xf32>
    %120 = arith.mulf %108, %119 : vector<2x8x128xf32>
    %121 = vector.shape_cast %99 : vector<8x128xf32> to vector<1x8x128xf32>
    %122 = vector.broadcast %121 : vector<1x8x128xf32> to vector<2x8x128xf32>
    %123 = arith.mulf %120, %122 : vector<2x8x128xf32>
    %124 = vector.shape_cast %100 : vector<8x128xf32> to vector<1x8x128xf32>
    %125 = vector.broadcast %124 : vector<1x8x128xf32> to vector<2x8x128xf32>
    %126 = arith.addf %123, %125 : vector<2x8x128xf32>
    %127 = vector.shape_cast %126 : vector<2x8x128xf32> to vector<16x128xf32>
    %c0_27 = arith.constant 0 : index
    %c0_28 = arith.constant 0 : index
    %128 = vector.load %arg8[%c0_27, %c0_28] : memref<128x512xf32, #tpu.memory_space<vmem>>, vector<128x512xf32>
    %cst_29 = arith.constant dense<0.000000e+00> : vector<16x512xf32>
    %129 = tpu.matmul %127, %128, %cst_29 {dimension_numbers = #tpu.dot_dimension_numbers<[1], [0], [0], [1], [0, 0, 1, 1], [], []>} : vector<16x128xf32>, vector<128x512xf32>, vector<16x512xf32> -> vector<16x512xf32>
    %c0_30 = arith.constant 0 : index
    %c0_31 = arith.constant 0 : index
    %130 = vector.load %arg9[%c0_30, %c0_31] : memref<1x512xf32, #tpu.memory_space<vmem>>, vector<1x512xf32>
    %131 = vector.broadcast %130 : vector<1x512xf32> to vector<16x512xf32>
    %132 = arith.addf %129, %131 : vector<16x512xf32>
    %cst_32 = arith.constant 5.000000e-01 : f32
    %133 = vector.broadcast %cst_32 : f32 to vector<16x512xf32>
    %134 = arith.mulf %133, %132 : vector<16x512xf32>
    %cst_33 = arith.constant 0.707106769 : f32
    %135 = vector.broadcast %cst_33 : f32 to vector<16x512xf32>
    %136 = arith.mulf %132, %135 : vector<16x512xf32>
    %137 = math.erf %136 : vector<16x512xf32>
    %cst_34 = arith.constant 1.000000e+00 : f32
    %138 = vector.broadcast %cst_34 : f32 to vector<16x512xf32>
    %139 = arith.addf %138, %137 : vector<16x512xf32>
    %140 = arith.mulf %134, %139 : vector<16x512xf32>
    %c0_35 = arith.constant 0 : index
    %c0_36 = arith.constant 0 : index
    %141 = vector.load %arg10[%c0_35, %c0_36] : memref<512x128xf32, #tpu.memory_space<vmem>>, vector<512x128xf32>
    %cst_37 = arith.constant dense<0.000000e+00> : vector<16x128xf32>
    %142 = tpu.matmul %140, %141, %cst_37 {dimension_numbers = #tpu.dot_dimension_numbers<[1], [0], [0], [1], [0, 0, 1, 1], [], []>} : vector<16x512xf32>, vector<512x128xf32>, vector<16x128xf32> -> vector<16x128xf32>
    %c0_38 = arith.constant 0 : index
    %c0_39 = arith.constant 0 : index
    %143 = vector.load %arg11[%c0_38, %c0_39] : memref<1x128xf32, #tpu.memory_space<vmem>>, vector<1x128xf32>
    %144 = vector.broadcast %143 : vector<1x128xf32> to vector<16x128xf32>
    %145 = arith.addf %142, %144 : vector<16x128xf32>
    %146 = vector.shape_cast %145 : vector<16x128xf32> to vector<2x8x128xf32>
    %147 = arith.addf %126, %146 : vector<2x8x128xf32>
    %c0_40 = arith.constant 0 : index
    %c0_41 = arith.constant 0 : index
    %148 = vector.load %arg12[%c0_40, %c0_41] : memref<8x128xf32, #tpu.memory_space<vmem>>, vector<8x128xf32>
    %c0_42 = arith.constant 0 : index
    %c0_43 = arith.constant 0 : index
    %149 = vector.load %arg13[%c0_42, %c0_43] : memref<8x128xf32, #tpu.memory_space<vmem>>, vector<8x128xf32>
    %cst_44 = arith.constant dense<0.000000e+00> : vector<2x8xf32>
    %150 = vector.multi_reduction <add>, %147, %cst_44 [2] : vector<2x8x128xf32> to vector<2x8xf32>
    %151 = vector.shape_cast %150 : vector<2x8xf32> to vector<2x8x1xf32>
    %cst_45 = arith.constant dense<0.000000e+00> : vector<2x1xf32>
    %152 = vector.multi_reduction <add>, %151, %cst_45 [1] : vector<2x8x1xf32> to vector<2x1xf32>
    %153 = vector.shape_cast %152 : vector<2x1xf32> to vector<2x1x1xf32>
    %cst_46 = arith.constant 1.024000e+03 : f32
    %154 = vector.broadcast %cst_46 : f32 to vector<2x1x1xf32>
    %155 = arith.divf %153, %154 : vector<2x1x1xf32>
    %156 = vector.broadcast %155 : vector<2x1x1xf32> to vector<2x8x128xf32>
    %157 = arith.subf %147, %156 : vector<2x8x128xf32>
    %158 = arith.mulf %157, %157 : vector<2x8x128xf32>
    %cst_47 = arith.constant dense<0.000000e+00> : vector<2x8xf32>
    %159 = vector.multi_reduction <add>, %158, %cst_47 [2] : vector<2x8x128xf32> to vector<2x8xf32>
    %160 = vector.shape_cast %159 : vector<2x8xf32> to vector<2x8x1xf32>
    %cst_48 = arith.constant dense<0.000000e+00> : vector<2x1xf32>
    %161 = vector.multi_reduction <add>, %160, %cst_48 [1] : vector<2x8x1xf32> to vector<2x1xf32>
    %162 = vector.shape_cast %161 : vector<2x1xf32> to vector<2x1x1xf32>
    %cst_49 = arith.constant 1.024000e+03 : f32
    %163 = vector.broadcast %cst_49 : f32 to vector<2x1x1xf32>
    %164 = arith.divf %162, %163 : vector<2x1x1xf32>
    %cst_50 = arith.constant 9.99999974E-6 : f32
    %165 = vector.broadcast %cst_50 : f32 to vector<2x1x1xf32>
    %166 = arith.addf %164, %165 : vector<2x1x1xf32>
    %167 = math.rsqrt %166 : vector<2x1x1xf32>
    %168 = vector.broadcast %167 : vector<2x1x1xf32> to vector<2x8x128xf32>
    %169 = arith.mulf %157, %168 : vector<2x8x128xf32>
    %170 = vector.shape_cast %148 : vector<8x128xf32> to vector<1x8x128xf32>
    %171 = vector.broadcast %170 : vector<1x8x128xf32> to vector<2x8x128xf32>
    %172 = arith.mulf %169, %171 : vector<2x8x128xf32>
    %173 = vector.shape_cast %149 : vector<8x128xf32> to vector<1x8x128xf32>
    %174 = vector.broadcast %173 : vector<1x8x128xf32> to vector<2x8x128xf32>
    %175 = arith.addf %172, %174 : vector<2x8x128xf32>
    %c0_51 = arith.constant 0 : index
    %c0_52 = arith.constant 0 : index
    %c0_53 = arith.constant 0 : index
    %176 = vector.load %arg14[%c0_51, %c0_52, %c0_53] : memref<2x8x128xf32, #tpu.memory_space<vmem>>, vector<2x8x128xf32>
    tpu.vector_store %arg14[%c0_51, %c0_52, %c0_53], %175 {strides = array<i32>} : memref<2x8x128xf32, #tpu.memory_space<vmem>>, vector<2x8x128xf32>,
    return
  }
  func.func @transform_0(%arg0: i32) -> (i32, i32, i32) {
    %c0_i32 = arith.constant 0 : i32
    %c0_i32_0 = arith.constant 0 : i32
    %c0_i32_1 = arith.constant 0 : i32
    return %arg0, %c0_i32, %c0_i32_0 : i32, i32, i32
  }
  func.func @transform_1(%arg0: i32) -> (i32, i32) {
    %c0_i32 = arith.constant 0 : i32
    %c0_i32_0 = arith.constant 0 : i32
    %c0_i32_1 = arith.constant 0 : i32
    return %c0_i32, %c0_i32_0 : i32, i32
  }
  func.func @transform_2(%arg0: i32) -> (i32, i32) {
    %c0_i32 = arith.constant 0 : i32
    %c0_i32_0 = arith.constant 0 : i32
    %c0_i32_1 = arith.constant 0 : i32
    return %c0_i32, %c0_i32_0 : i32, i32
  }
  func.func @transform_3(%arg0: i32) -> (i32, i32) {
    %c0_i32 = arith.constant 0 : i32
    %c0_i32_0 = arith.constant 0 : i32
    %c0_i32_1 = arith.constant 0 : i32
    return %c0_i32, %c0_i32_0 : i32, i32
  }
  func.func @transform_4(%arg0: i32) -> (i32, i32) {
    %c0_i32 = arith.constant 0 : i32
    %c0_i32_0 = arith.constant 0 : i32
    %c0_i32_1 = arith.constant 0 : i32
    return %c0_i32, %c0_i32_0 : i32, i32
  }
  func.func @transform_5(%arg0: i32) -> (i32, i32) {
    %c0_i32 = arith.constant 0 : i32
    %c0_i32_0 = arith.constant 0 : i32
    %c0_i32_1 = arith.constant 0 : i32
    return %c0_i32, %c0_i32_0 : i32, i32
  }
  func.func @transform_6(%arg0: i32) -> (i32, i32) {
    %c0_i32 = arith.constant 0 : i32
    %c0_i32_0 = arith.constant 0 : i32
    %c0_i32_1 = arith.constant 0 : i32
    return %c0_i32, %c0_i32_0 : i32, i32
  }
  func.func @transform_7(%arg0: i32) -> (i32, i32) {
    %c0_i32 = arith.constant 0 : i32
    %c0_i32_0 = arith.constant 0 : i32
    %c0_i32_1 = arith.constant 0 : i32
    return %c0_i32, %c0_i32_0 : i32, i32
  }
  func.func @transform_8(%arg0: i32) -> (i32, i32) {
    %c0_i32 = arith.constant 0 : i32
    %c0_i32_0 = arith.constant 0 : i32
    %c0_i32_1 = arith.constant 0 : i32
    return %c0_i32, %c0_i32_0 : i32, i32
  }
  func.func @transform_9(%arg0: i32) -> (i32, i32) {
    %c0_i32 = arith.constant 0 : i32
    %c0_i32_0 = arith.constant 0 : i32
    %c0_i32_1 = arith.constant 0 : i32
    return %c0_i32, %c0_i32_0 : i32, i32
  }
  func.func @transform_10(%arg0: i32) -> (i32, i32) {
    %c0_i32 = arith.constant 0 : i32
    %c0_i32_0 = arith.constant 0 : i32
    %c0_i32_1 = arith.constant 0 : i32
    return %c0_i32, %c0_i32_0 : i32, i32
  }
  func.func @transform_11(%arg0: i32) -> (i32, i32) {
    %c0_i32 = arith.constant 0 : i32
    %c0_i32_0 = arith.constant 0 : i32
    %c0_i32_1 = arith.constant 0 : i32
    return %c0_i32, %c0_i32_0 : i32, i32
  }
  func.func @transform_12(%arg0: i32) -> (i32, i32) {
    %c0_i32 = arith.constant 0 : i32
    %c0_i32_0 = arith.constant 0 : i32
    %c0_i32_1 = arith.constant 0 : i32
    return %c0_i32, %c0_i32_0 : i32, i32
  }
  func.func @transform_13(%arg0: i32) -> (i32, i32, i32) {
    %c0_i32 = arith.constant 0 : i32
    %c0_i32_0 = arith.constant 0 : i32
    %c0_i32_1 = arith.constant 0 : i32
    return %arg0, %c0_i32, %c0_i32_0 : i32, i32, i32
  }
}

</mosaic_0001>

<bundles_post_ra>
// kernel: tpu_custom_call.1
= control target key start
LH: loop header
LB: loop body
LE: loop exit
PB: predicated region body
PF: predicated region fallthrough
CT: control target
= control target key end

     0   :  { %18 = vsyncpa [#allocation3], 0  ;;  %s3592_s0 = inlined_call_operand.hbm [shape: f32[2,8,128], index: 0, kind: input, shape index: {}]   ;;  %s3593_s1 = inlined_call_operand.hbm [shape: f32[128,384], index: 1, kind: input, shape index: {}]   ;;  %s3594_s2 = inlined_call_operand.hbm [shape: f32[1,384], index: 2, kind: input, shape index: {}]   ;;  %s3595_s3 = inlined_call_operand.hbm [shape: f32[128,128], index: 3, kind: input, shape index: {}]   ;;  %s3596_s4 = inlined_call_operand.vmem [shape: f32[1,128], index: 4, kind: input, shape index: {}]   ;;  %s3597_s5 = inlined_call_operand.hbm [shape: f32[8,128], index: 5, kind: input, shape index: {}]   ;;  %s3598_s6 = inlined_call_operand.hbm [shape: f32[8,128], index: 6, kind: input, shape index: {}]   ;;  %s3599_s7 = inlined_call_operand.hbm [shape: f32[128,512], index: 7, kind: input, shape index: {}]   ;;  %s3600_s8 = inlined_call_operand.hbm [shape: f32[1,512], index: 8, kind: input, shape index: {}]   ;;  %s3601_s9 = inlined_call_operand.hbm [shape: f32[512,128], index: 9, kind: input, shape index: {}]   ;;  %s3602_s10 = inlined_call_operand.vmem [shape: f32[1,128], index: 10, kind: input, shape index: {}]   ;;  %s3603_s11 = inlined_call_operand.vmem [shape: f32[8,128], index: 11, kind: input, shape index: {}]   ;;  %s3604_s12 = inlined_call_operand.hbm [shape: f32[8,128], index: 12, kind: input, shape index: {}]   ;;  %s3605_s13 = inlined_call_operand.hbm [shape: f32[2,8,128], index: 13, kind: output, shape index: {}]  }
   0x1   :  { %19 = vsyncpa [#allocation6], 0 }
   0x2   :  { %20 = vsyncpa [#allocation9], 0 }
   0x3   :  { %21 = vsyncpa [#allocation12], 0 }
   0x4   :  { %22 = vsyncpa [#allocation15], 0 }
   0x5   :  { %23 = vsyncpa [#allocation18], 0  ;;  %s42_s27 = sshll.u32 %s3593_s1, 4  ;;  %s43_s27 = int_to_ptr.hbm [resolvable:$true] %s42_s27 }
   0x6   :  { %24 = vsyncpa [#allocation4], 0  ;;  %s2825_s28 = smov [#allocation5]   ;;  %s2826_s30 = smov 384  }
   0x7   :  { %s44_s29 = sshll.u32 %s2825_s28, 4  ;;  %s2827_s14 = smov 24   ;;  %s45_s29 = int_to_ptr.vmem [resolvable:$true] %s44_s29 }
   0x8   :  { %50 = dma.hbm_to_vmem [thread:$0]  %s43_s27, 6144, %s45_s29, [#allocation6], %s2826_s30, %s2826_s30, %s2827_s14  }
   0x9   :  { %s66_s17 = sshll.u32 %s3595_s3, 4  ;;  %s2828_s18 = smov [#allocation8]   ;;  %s67_s17 = int_to_ptr.hbm [resolvable:$true] %s66_s17 }
   0xa   :  { %s68_s19 = sshll.u32 %s2828_s18, 4  ;;  %s93_s22 = sshll.u32 %s3598_s6, 4  ;;  %s69_s19 = int_to_ptr.vmem [resolvable:$true] %s68_s19  ;;  %s94_s22 = int_to_ptr.hbm [resolvable:$true] %s93_s22 }
   0xb   :  { %s2829_s1 = smov 128   ;;  %s2830_s23 = smov 8  }
   0xc   :  { %74 = dma.hbm_to_vmem [thread:$0]  %s67_s17, 2048, %s69_s19, [#allocation9], %s2829_s1, %s2829_s1, %s2830_s23  }
   0xd   :  { %s117_s26 = sshll.u32 %s3600_s8, 4  ;;  %s2831_s3 = smov [#allocation11]   ;;  %s118_s26 = int_to_ptr.hbm [resolvable:$true] %s117_s26 }
   0xe   :  { %s95_s27 = sshll.u32 %s2831_s3, 4  ;;  %s2832_s28 = smov [#allocation14]   ;;  %s96_s27 = int_to_ptr.vmem [resolvable:$true] %s95_s27 }
   0xf   :  { %98 = dma.hbm_to_vmem [thread:$0]  %s94_s22, 128, %s96_s27, [#allocation12]  }
  0x10   :  { %s119_s29 = sshll.u32 %s2832_s28, 4  ;;  %s29_s14 = sshll.u32 %s3592_s0, 4  ;;  %s120_s29 = int_to_ptr.vmem [resolvable:$true] %s119_s29  ;;  %s30_s14 = int_to_ptr.hbm [resolvable:$true] %s29_s14 }
  0x11   :  { %122 = dma.hbm_to_vmem [thread:$0]  %s118_s26, 64, %s120_s29, [#allocation15]  }
  0x12   :  { %s56_s17 = sshll.u32 %s3594_s2, 4  ;;  %s2833_s18 = smov [#allocation2]   ;;  %s57_s17 = int_to_ptr.hbm [resolvable:$true] %s56_s17 }
  0x13   :  { %s31_s8 = sshll.u32 %s2833_s18, 4  ;;  %s2834_s19 = smov [#allocation7]   ;;  %s32_s8 = int_to_ptr.vmem [resolvable:$true] %s31_s8 }
  0x14   :  { %37 = dma.hbm_to_vmem [thread:$0]  %s30_s14, 256, %s32_s8, [#allocation3], %s2829_s1, %s2829_s1, %s2830_s23  }
  0x15   :  { %s58_s20 = sshll.u32 %s2834_s19, 4  ;;  %s82_s0 = sshll.u32 %s3597_s5, 4  ;;  %s59_s20 = int_to_ptr.vmem [resolvable:$true] %s58_s20  ;;  %s83_s0 = int_to_ptr.hbm [resolvable:$true] %s82_s0 }
  0x16   :  { %61 = dma.hbm_to_vmem [thread:$0]  %s57_s17, 48, %s59_s20, [#allocation6]  }
  0x17   :  { %s103_s2 = sshll.u32 %s3599_s7, 4  ;;  %s2835_s26 = smov [#allocation10]   ;;  %s104_s2 = int_to_ptr.hbm [resolvable:$true] %s103_s2 }
  0x18   :  { %s84_s3 = sshll.u32 %s2835_s26, 4  ;;  %s2836_s27 = smov [#allocation13]   ;;  %s85_s3 = int_to_ptr.vmem [resolvable:$true] %s84_s3 }
  0x19   :  { %87 = dma.hbm_to_vmem [thread:$0]  %s83_s0, 128, %s85_s3, [#allocation9]  }
  0x1a   :  { %s105_s28 = sshll.u32 %s2836_s27, 4  ;;  %s2837_s29 = smov 512   ;;  %s106_s28 = int_to_ptr.vmem [resolvable:$true] %s105_s28 }
  0x1b   :  { %s2838_s6 = smov 32   ;;  %s127_s14 = sshll.u32 %s3601_s9, 4  ;;  %s128_s14 = int_to_ptr.hbm [resolvable:$true] %s127_s14 }
  0x1c   :  { %111 = dma.hbm_to_vmem [thread:$0]  %s104_s2, 8192, %s106_s28, [#allocation12], %s2837_s29, %s2837_s29, %s2838_s6  }
  0x1d   :  { %s2839_s15 = smov [#allocation16]   ;;  %s145_s18 = sshll.u32 %s3604_s12, 4  ;;  %s146_s18 = int_to_ptr.hbm [resolvable:$true] %s145_s18 }
  0x1e   :  { %s129_s16 = sshll.u32 %s2839_s15, 4  ;;  %s2840_s8 = smov [#allocation17]   ;;  %s130_s16 = int_to_ptr.vmem [resolvable:$true] %s129_s16 }
  0x1f   :  { %135 = dma.hbm_to_vmem [thread:$0]  %s128_s14, 8192, %s130_s16, [#allocation15], %s2829_s1, %s2829_s1, %s2830_s23  }
  0x20   :  { %s147_s19 = sshll.u32 %s2840_s8, 4  ;;  %s148_s19 = int_to_ptr.vmem [resolvable:$true] %s147_s19 }
  0x21   :  { %150 = dma.hbm_to_vmem [thread:$0]  %s146_s18, 128, %s148_s19, [#allocation18]  }
  0x22   :  { %2811 = dma.done.wait [#allocation3], 256  }
  0x23   :  { %2812 = vsyncadd [#allocation3], 4294967040 }
  0x24   :  { %2813 = dma.done.wait [#allocation6], 6192  }
  0x25   :  { %2814 = vsyncadd [#allocation6], 4294961104 }
  0x26   :  { %2815 = dma.done.wait [#allocation9], 2176  }
  0x27   :  { %2816 = vsyncadd [#allocation9], 4294965120 }
  0x28   :  { %2817 = dma.done.wait [#allocation12], 8320  }
  0x29   :  { %2818 = vsyncadd [#allocation12], 4294958976 }
  0x2a   :  { %2819 = dma.done.wait [#allocation15], 8256  }
  0x2b   :  { %2820 = vsyncadd [#allocation15], 4294959040 }
  0x2c   :  { %2821 = dma.done.wait [#allocation18], 128  }
  0x2d   :  { %2822 = vsyncadd [#allocation18], 4294967168  ;;  %v239_v0 = vld [vmem:[#allocation5 + $0x170] sm:$0xff]  ;;  %v238_v1 = vld [vmem:[#allocation5 + $0x168] sm:$0xff]  ;;  %vm424_vm0 = vcmask 130048   ;;  %s2841_s9 = smov 64  }
  0x2e   :  { %v236_v2 = vld [vmem:[#allocation5 + $0x158] sm:$0xff]  ;;  %272 = vmatpush.msra.mxu1 %v239_v0  ;;  %249 = vmatpush.msra.mxu0 %v238_v1  ;;  %v235_v3 = vld [vmem:[#allocation5 + $0x150] sm:$0xff]  ;;  %v233_v4 = vld [vmem:[#allocation5 + $0x140] sm:$0xff]  ;;  %s2842_s12 = smov 96   ;;  %s2843_s20 = smov 112   ;;  %vm809_vm1 = vcmask 64512  }
  0x2f   :  { %v232_v5 = vld [vmem:[#allocation5 + $0x138] sm:$0xff]  ;;  %v230_v6 = vld [vmem:[#allocation5 + $0x128] sm:$0xff]  ;;  %v229_v7 = vld [vmem:[#allocation5 + $0x120] sm:$0xff]  ;;  %s2844_s21 = smov 80   ;;  %s2845_s22 = smov 48   ;;  %vm1412_vm2 = vcmask 261120  }
  0x30   :  { %273 = vmatpush.msra.mxu1 %v236_v2  ;;  %250 = vmatpush.msra.mxu0 %v235_v3  ;;  %v227_v8 = vld [vmem:[#allocation5 + $0x110] sm:$0xff]  ;;  %v226_v9 = vld [vmem:[#allocation5 + $0x108] sm:$0xff]  ;;  %v224_v10 = vld [vmem:[#allocation5 + $0xf8] sm:$0xff]  ;;  %s2846_s0 = smov 16   ;;  %vm1415_vm3 = vcmask 392192   ;;  %vm1418_vm4 = vcmask 523264  }
  0x31   :  { %v223_v11 = vld [vmem:[#allocation5 + $0xf0] sm:$0xff]  ;;  %v221_v12 = vld [vmem:[#allocation5 + $0xe0] sm:$0xff]  ;;  %v220_v13 = vld [vmem:[#allocation5 + $0xd8] sm:$0xff]  ;;  %vm1421_vm5 = vcmask 654336   ;;  %vm1424_vm6 = vcmask 785408   ;;  %vm1427_vm7 = vcmask 916480  }
  0x32   :  { %274 = vmatpush.msra.mxu1 %v233_v4  ;;  %251 = vmatpush.msra.mxu0 %v232_v5  ;;  %v240_v14 = vld [vmem:[#allocation5 + $0x178] sm:$0xff]  ;;  %v237_v15 = vld [vmem:[#allocation5 + $0x160] sm:$0xff]  ;;  %v218_v16 = vld [vmem:[#allocation5 + $0xc8] sm:$0xff]  ;;  %s2310_s29 = sshll.u32 %s3605_s13, 4  ;;  %s2311_s29 = int_to_ptr.hbm [resolvable:$true] %s2310_s29 }
  0x33   :  { %v217_v17 = vld [vmem:[#allocation5 + $0xc0] sm:$0xff]  ;;  %295 = vmatpush.msra.mxu2 %v240_v14  ;;  %v234_v18 = vld [vmem:[#allocation5 + $0x148] sm:$0xff]  ;;  %v215_v19 = vld [vmem:[#allocation5 + $0xb0] sm:$0xff] }
  0x34   :  { %275 = vmatpush.msra.mxu1 %v230_v6  ;;  %252 = vmatpush.msra.mxu0 %v229_v7  ;;  %v214_v20 = vld [vmem:[#allocation5 + $0xa8] sm:$0xff]  ;;  %v231_v21 = vld [vmem:[#allocation5 + $0x130] sm:$0xff]  ;;  %v212_v22 = vld [vmem:[#allocation5 + $0x98] sm:$0xff] }
  0x35   :  { %296 = vmatpush.msra.mxu2 %v237_v15  ;;  %v211_v23 = vld [vmem:[#allocation5 + $0x90] sm:$0xff]  ;;  %v228_v24 = vld [vmem:[#allocation5 + $0x118] sm:$0xff]  ;;  %v209_v25 = vld [vmem:[#allocation5 + $0x80] sm:$0xff] }
  0x36   :  { %276 = vmatpush.msra.mxu1 %v227_v8  ;;  %253 = vmatpush.msra.mxu0 %v226_v9  ;;  %v208_v26 = vld [vmem:[#allocation5 + $0x78] sm:$0xff]  ;;  %v225_v27 = vld [vmem:[#allocation5 + $0x100] sm:$0xff]  ;;  %v206_v28 = vld [vmem:[#allocation5 + $0x68] sm:$0xff] }
  0x37   :  { %297 = vmatpush.msra.mxu2 %v234_v18  ;;  %v205_v29 = vld [vmem:[#allocation5 + $0x60] sm:$0xff]  ;;  %v222_v30 = vld [vmem:[#allocation5 + $0xe8] sm:$0xff]  ;;  %v203_v31 = vld [vmem:[#allocation5 + $0x50] sm:$0xff] }
  0x38   :  { %277 = vmatpush.msra.mxu1 %v224_v10  ;;  %254 = vmatpush.msra.mxu0 %v223_v11  ;;  %v202_v32 = vld [vmem:[#allocation5 + $0x48] sm:$0xff]  ;;  %v219_v33 = vld [vmem:[#allocation5 + $0xd0] sm:$0xff]  ;;  %v200_v34 = vld [vmem:[#allocation5 + $0x38] sm:$0xff] }
  0x39   :  { %298 = vmatpush.msra.mxu2 %v231_v21  ;;  %v199_v35 = vld [vmem:[#allocation5 + $0x30] sm:$0xff]  ;;  %v216_v36 = vld [vmem:[#allocation5 + $0xb8] sm:$0xff]  ;;  %v197_v37 = vld [vmem:[#allocation5 + $0x20] sm:$0xff] }
  0x3a   :  { %278 = vmatpush.msra.mxu1 %v221_v12  ;;  %255 = vmatpush.msra.mxu0 %v220_v13  ;;  %v196_v38 = vld [vmem:[#allocation5 + $0x18] sm:$0xff]  ;;  %v213_v39 = vld [vmem:[#allocation5 + $0xa0] sm:$0xff]  ;;  %v194_v40 = vld [vmem:[#allocation5 + $0x8] sm:$0xff] }
  0x3b   :  { %299 = vmatpush.msra.mxu2 %v228_v24  ;;  %v193_v41 = vld [vmem:[#allocation5] sm:$0xff]  ;;  %v191_v42 = vld [vmem:[#allocation2] sm:$0xff]  ;;  %v210_v43 = vld [vmem:[#allocation5 + $0x88] sm:$0xff] }
  0x3c   :  { %279 = vmatpush.msra.mxu1 %v218_v16  ;;  %256 = vmatpush.msra.mxu0 %v217_v17  ;;  %v207_v44 = vld [vmem:[#allocation5 + $0x70] sm:$0xff]  ;;  %v204_v45 = vld [vmem:[#allocation5 + $0x58] sm:$0xff]  ;;  %v201_v46 = vld [vmem:[#allocation5 + $0x40] sm:$0xff] }
  0x3d   :  { %300 = vmatpush.msra.mxu2 %v225_v27  ;;  %v192_v47 = vld [vmem:[#allocation2 + $0x8] sm:$0xff]  ;;  %v198_v48 = vld [vmem:[#allocation5 + $0x28] sm:$0xff]  ;;  %v195_v49 = vld [vmem:[#allocation5 + $0x10] sm:$0xff] }
  0x3e   :  { %280 = vmatpush.msra.mxu1 %v215_v19  ;;  %257 = vmatpush.msra.mxu0 %v214_v20  ;;  %v241_v50 = vld [vmem:[#allocation7] sm:$0x7] }
  0x3f   :  { %301 = vmatpush.msra.mxu2 %v222_v30  ;;  %v244_v51 = vperm.slane %v241_v50, 1  ;;  %v243_v52 = vperm.slane %v241_v50, 0  ;;  %v245_v63 = vperm.slane %v241_v50, 2 }
  0x40   :  { %281 = vmatpush.msra.mxu1 %v212_v22  ;;  %258 = vmatpush.msra.mxu0 %v211_v23 }
  0x41   :  { %302 = vmatpush.msra.mxu2 %v219_v33 }
  0x42   :  { %282 = vmatpush.msra.mxu1 %v209_v25  ;;  %259 = vmatpush.msra.mxu0 %v208_v26 }
  0x43   :  { %303 = vmatpush.msra.mxu2 %v216_v36 }
  0x44   :  { %283 = vmatpush.msra.mxu1 %v206_v28  ;;  %260 = vmatpush.msra.mxu0 %v205_v29 }
  0x45   :  { %304 = vmatpush.msra.mxu2 %v213_v39 }
  0x46   :  { %284 = vmatpush.msra.mxu1 %v203_v31  ;;  %261 = vmatpush.msra.mxu0 %v202_v32 }
  0x47   :  { %305 = vmatpush.msra.mxu2 %v210_v43 }
  0x48   :  { %285 = vmatpush.msra.mxu1 %v200_v34  ;;  %262 = vmatpush.msra.mxu0 %v199_v35 }
  0x49   :  { %306 = vmatpush.msra.mxu2 %v207_v44 }
  0x4a   :  { %286 = vmatpush.msra.mxu1 %v197_v37  ;;  %263 = vmatpush.msra.mxu0 %v196_v38 }
  0x4b   :  { %307 = vmatpush.msra.mxu2 %v204_v45 }
  0x4c   :  { %287 = vmatpush.msra.mxu1 %v194_v40  ;;  %264 = vmatpush.msra.mxu0 %v193_v41 }
  0x4d   :  { %288 = vmatmul.f32.vlgmr.msra.gmra.mxu1 %v191_v42  ;;  %265 = vmatmul.f32.vlgmr.msra.gmra.mxu0 %v191_v42 }
  0x4e   :  { %308 = vmatpush.msra.mxu2 %v201_v46 }
  0x50   :  { %309 = vmatpush.msra.mxu2 %v198_v48 }
  0x52   :  { %310 = vmatpush.msra.mxu2 %v195_v49 }
  0x53   :  { %311 = vmatmul.f32.vlgmr.msra.gmra.mxu2 %v191_v42 }
  0x55   :  { %291 = vmatmul.f32.gmra.mxu1 %v192_v47  ;;  %268 = vmatmul.f32.gmra.mxu0 %v192_v47 }
  0x5b   :  { %314 = vmatmul.f32.gmra.mxu2 %v192_v47 }
  0xca   :  { %v289_v53 = vpop.f32.mrf.mxu1  ;;  %v266_v54 = vpop.f32.mrf.mxu0 }
  0xcb   :  { %v290_v55 = vadd.f32 %v289_v53, %v244_v51  ;;  %v267_v56 = vadd.f32 %v266_v54, %v243_v52 }
  0xcd   :  { %v318_v57 = vmul.f32 0.25, %v267_v56  ;;  %364 = vrot.lane.b32.xlu1 %v290_v55, %s2841_s9  ;;  %356 = vrot.lane.b32.xlu2 %v290_v55, %s2842_s12 }
  0xce   :  { %352 = vrot.lane.b32.xlu0 %v290_v55, %s2843_s20  ;;  %2328 = vmatpush.xpose.msk.msra.mxu3 %vm424_vm0, %v290_v55 }
  0xd1   :  { %2329 = vmatmul.msk.f32.vlgmr.msra.gmra.mxu3 %vm424_vm0, %v318_v57 }
  0xd2   :  { %v292_v58 = vpop.f32.mrf.mxu1  ;;  %v269_v59 = vpop.f32.mrf.mxu0 }
  0xd3   :  { %v293_v60 = vadd.f32 %v292_v58, %v244_v51  ;;  %v270_v61 = vadd.f32 %v269_v59, %v243_v52 }
  0xd5   :  { %v319_v62 = vmul.f32 0.25, %v270_v61  ;;  %354 = vrot.lane.b32.xlu1 %v293_v60, %s2843_s20  ;;  %360 = vrot.lane.b32.xlu2 %v290_v55, %s2844_s21 }
  0xd6   :  { %2330 = vmatpush.xpose.msk.msrb.mxu3 %vm424_vm0, %v293_v60  ;;  %322 = vrot.lane.b32.xlu0 %v318_v57, %s2843_s20  ;;  %v312_v0 = vpop.f32.mrf.mxu2 }
  0xd7   :  { %v2981_v1 = vadd.f32 %v312_v0, %v245_v63 }
  0xd9   :  { %2331 = vmatmul.msk.f32.vlgmr.msrb.gmra.mxu3 %vm424_vm0, %v319_v62  ;;  %1004 = vmatpush.msrb.mxu2 %v2981_v1 }
  0xdd   :  { %324 = vrot.lane.b32.xlu1 %v319_v62, %s2843_s20  ;;  %326 = vrot.lane.b32.xlu2 %v318_v57, %s2842_s12 }
  0xde   :  { %368 = vrot.lane.b32.xlu0 %v290_v55, %s2845_s22  ;;  %v315_v2 = vpop.f32.mrf.mxu2 }
  0xdf   :  { %v2992_v3 = vadd.f32 %v315_v2, %v245_v63 }
  0xe1   :  { %v2997_v4 = vpack.i.bf16 %v2992_v3, %v2981_v1 }
  0xe5   :  { %338 = vrot.lane.b32.xlu1 %v318_v57, %s2845_s22  ;;  %334 = vrot.lane.b32.xlu2 %v318_v57, %s2841_s9 }
  0xe6   :  { %330 = vrot.lane.b32.xlu0 %v318_v57, %s2844_s21 }
  0xed   :  { %328 = vrot.lane.b32.xlu1 %v319_v62, %s2842_s12  ;;  %366 = vrot.lane.b32.xlu2 %v293_v60, %s2841_s9 }
  0xee   :  { %358 = vrot.lane.b32.xlu0 %v293_v60, %s2842_s12 }
  0xf5   :  { %362 = vrot.lane.b32.xlu1 %v293_v60, %s2844_s21  ;;  %372 = vrot.lane.b32.xlu2 %v290_v55, %s2838_s6 }
  0xf6   :  { %336 = vrot.lane.b32.xlu0 %v319_v62, %s2841_s9 }
  0xfd   :  { %342 = vrot.lane.b32.xlu1 %v318_v57, %s2838_s6  ;;  %374 = vrot.lane.b32.xlu2 %v293_v60, %s2838_s6 }
  0xfe   :  { %332 = vrot.lane.b32.xlu0 %v319_v62, %s2844_s21 }
 0x105   :  { %370 = vrot.lane.b32.xlu1 %v293_v60, %s2845_s22  ;;  %376 = vrot.lane.b32.xlu2 %v290_v55, %s2846_s0 }
 0x106   :  { %344 = vrot.lane.b32.xlu0 %v319_v62, %s2838_s6 }
 0x10d   :  { %346 = vrot.lane.b32.xlu1 %v318_v57, %s2846_s0  ;;  %378 = vrot.lane.b32.xlu2 %v293_v60, %s2846_s0 }
 0x10e   :  { %340 = vrot.lane.b32.xlu0 %v319_v62, %s2845_s22 }
 0x115   :  { %2409 = vrot.lane.b32.xlu1 %v2997_v4, %s2843_s20  ;;  %2414 = vrot.lane.b32.xlu2 %v2997_v4, %s2842_s12 }
 0x116   :  { %348 = vrot.lane.b32.xlu0 %v319_v62, %s2846_s0 }
 0x127   :  { %v357_v5 = vpop.permute.xlu2 %356 }
 0x12f   :  { %v361_v6 = vpop.permute.xlu2 %360 }
 0x130   :  { %2340 = vmatpush.xpose.msk.msrb.mxu0 %vm424_vm0, %v361_v6 }
 0x137   :  { %v327_v7 = vpop.permute.xlu2 %326 }
 0x13f   :  { %v365_v8 = vpop.permute.xlu1 %364  ;;  %v335_v9 = vpop.permute.xlu2 %334 }
 0x140   :  { %v353_v10 = vpop.permute.xlu0 %352 }
 0x141   :  { %2332 = vmatpush.xpose.msk.msra.mxu3 %vm424_vm0, %v353_v10 }
 0x147   :  { %v355_v11 = vpop.permute.xlu1 %354  ;;  %v367_v12 = vpop.permute.xlu2 %366 }
 0x148   :  { %v323_v13 = vpop.permute.xlu0 %322  ;;  %2334 = vmatpush.xpose.msk.msrb.mxu3 %vm424_vm0, %v355_v11 }
 0x149   :  { %2333 = vmatmul.msk.f32.vlgmr.msra.gmra.mxu3 %vm424_vm0, %v323_v13 }
 0x14c   :  { %2336 = vmatpush.xpose.msk.msra.mxu3 %vm424_vm0, %v357_v5 }
 0x14f   :  { %v325_v14 = vpop.permute.xlu1 %324  ;;  %v373_v15 = vpop.permute.xlu2 %372 }
 0x150   :  { %v369_v16 = vpop.permute.xlu0 %368 }
 0x151   :  { %2335 = vmatmul.msk.f32.vlgmr.msrb.gmra.mxu3 %vm424_vm0, %v325_v14  ;;  %2348 = vmatpush.xpose.msk.msra.mxu0 %vm424_vm0, %v369_v16 }
 0x154   :  { %v446_v17 = vpop.f32.mrf.mxu3 }
 0x155   :  { %v810_v18 = vsel %vm809_vm1, %v446_v17, -inf }
 0x156   :  { %811 = vmax.xlane.f32.xlu1 %v810_v18 }
 0x157   :  { %v339_v19 = vpop.permute.xlu1 %338  ;;  %v375_v20 = vpop.permute.xlu2 %374 }
 0x158   :  { %v331_v21 = vpop.permute.xlu0 %330 }
 0x159   :  { %2337 = vmatmul.msk.f32.vlgmr.msra.gmra.mxu3 %vm424_vm0, %v327_v7  ;;  %2341 = vmatmul.msk.f32.vlgmr.msrb.gmra.mxu0 %vm424_vm0, %v331_v21 }
 0x15a   :  { %2352 = vmatpush.xpose.msk.msrb.mxu0 %vm424_vm0, %v373_v15 }
 0x15c   :  { %v3015_v22 = vpop.f32.mrf.mxu3 }
 0x15d   :  { %v813_v23 = vsel %vm809_vm1, %v3015_v22, -inf }
 0x15e   :  { %814 = vmax.xlane.f32.xlu0 %v813_v23 }
 0x15f   :  { %v329_v24 = vpop.permute.xlu1 %328  ;;  %v377_v25 = vpop.permute.xlu2 %376 }
 0x160   :  { %v359_v26 = vpop.permute.xlu0 %358 }
 0x161   :  { %2338 = vmatpush.xpose.msk.msrb.mxu3 %vm424_vm0, %v359_v26  ;;  %2349 = vmatmul.msk.f32.vlgmr.msra.gmra.mxu0 %vm424_vm0, %v339_v19 }
 0x162   :  { %2356 = vmatpush.xpose.msk.msra.mxu0 %vm424_vm0, %v377_v25 }
 0x164   :  { %2339 = vmatmul.msk.f32.vlgmr.msrb.gmra.mxu3 %vm424_vm0, %v329_v24 }
 0x165   :  { %2344 = vmatpush.xpose.msk.msra.mxu3 %vm424_vm0, %v365_v8 }
 0x167   :  { %v363_v27 = vpop.permute.xlu1 %362  ;;  %v379_v32 = vpop.permute.xlu2 %378 }
 0x168   :  { %v337_v28 = vpop.permute.xlu0 %336  ;;  %2342 = vmatpush.xpose.msk.msrb.mxu1 %vm424_vm0, %v363_v27 }
 0x169   :  { %2346 = vmatpush.xpose.msk.msrb.mxu3 %vm424_vm0, %v367_v12 }
 0x16c   :  { %2345 = vmatmul.msk.f32.vlgmr.msra.gmra.mxu3 %vm424_vm0, %v335_v9 }
 0x16d   :  { %2354 = vmatpush.xpose.msk.msra.mxu3 %vm424_vm0, %v375_v20 }
 0x16f   :  { %v343_v29 = vpop.permute.xlu1 %342  ;;  %v2415_v40 = vpop.permute.xlu2 %2414 }
 0x170   :  { %v333_v30 = vpop.permute.xlu0 %332  ;;  %2353 = vmatmul.msk.f32.vlgmr.msrb.gmra.mxu0 %vm424_vm0, %v343_v29  ;;  %v2417_v41 = vunpack.i.h.bf16 %v2415_v40  ;;  %v2416_v42 = vunpack.i.l.bf16 %v2415_v40 }
 0x171   :  { %2343 = vmatmul.msk.f32.vlgmr.msrb.gmra.mxu1 %vm424_vm0, %v333_v30 }
 0x172   :  { %1096 = vmatpush.msra.mxu2 %v2416_v42 }
 0x174   :  { %2347 = vmatmul.msk.f32.vlgmr.msrb.gmra.mxu3 %vm424_vm0, %v337_v28 }
 0x175   :  { %1027 = vmatpush.msrb.mxu3 %v2992_v3 }
 0x177   :  { %v371_v31 = vpop.permute.xlu1 %370 }
 0x178   :  { %v345_v33 = vpop.permute.xlu0 %344  ;;  %2350 = vmatpush.xpose.msk.msra.mxu1 %vm424_vm0, %v371_v31 }
 0x17c   :  { %2358 = vmatpush.xpose.msk.msrb.mxu1 %vm424_vm0, %v379_v32  ;;  %2355 = vmatmul.msk.f32.vlgmr.msra.gmra.mxu3 %vm424_vm0, %v345_v33 }
 0x17d   :  { %1119 = vmatpush.msra.mxu3 %v2417_v41 }
 0x17f   :  { %v347_v34 = vpop.permute.xlu1 %346 }
 0x180   :  { %v341_v35 = vpop.permute.xlu0 %340  ;;  %2357 = vmatmul.msk.f32.vlgmr.msra.gmra.mxu0 %vm424_vm0, %v347_v34 }
 0x181   :  { %2351 = vmatmul.msk.f32.vlgmr.msra.gmra.mxu1 %vm424_vm0, %v341_v35 }
 0x187   :  { %v2410_v36 = vpop.permute.xlu1 %2409 }
 0x188   :  { %v349_v37 = vpop.permute.xlu0 %348  ;;  %v2412_v38 = vunpack.i.h.bf16 %v2410_v36  ;;  %v2411_v39 = vunpack.i.l.bf16 %v2410_v36 }
 0x189   :  { %2359 = vmatmul.msk.f32.vlgmr.msrb.gmra.mxu1 %vm424_vm0, %v349_v37 }
 0x18a   :  { %1050 = vmatpush.msrb.mxu0 %v2411_v39  ;;  %1073 = vmatpush.msra.mxu1 %v2412_v38 }
 0x1c9   :  { %v812_v43 = vpop.xlane.xlu1 %811 }
 0x1ca   :  { %v858_v44 = vsub.f32 %v446_v17, %v812_v43 }
 0x1cc   :  { %v3038_v45 = vpop.f32.mrf.mxu3  ;;  %v874_v46 = vmul.f32 1.442695, %v858_v44 }
 0x1cd   :  { %v816_v55 = vsel %vm809_vm1, %v3038_v45, -inf }
 0x1ce   :  { %2455 = vpow2.f32 %v874_v46 }
 0x1d1   :  { %v815_v62 = vpop.xlane.xlu0 %814 }
 0x1d2   :  { %v859_v0 = vsub.f32 %v3015_v22, %v815_v62 }
 0x1d4   :  { %v3040_v47 = vpop.f32.mrf.mxu3  ;;  %v3045_v51 = vpop.eup %2455  ;;  %v876_v9 = vmul.f32 1.442695, %v859_v0 }
 0x1d5   :  { %v819_v48 = vsel %vm809_vm1, %v3040_v47, -inf  ;;  %v906_v52 = vsel %vm809_vm1, %v3045_v51, 0.0 }
 0x1d6   :  { %v590_v49 = vpop.f32.mrf.mxu0  ;;  %820 = vmax.xlane.f32.xlu1 %v819_v48  ;;  %2457 = vpow2.f32 %v876_v9 }
 0x1d7   :  { %v828_v50 = vsel %vm809_vm1, %v590_v49, -inf }
 0x1d8   :  { %829 = vmax.xlane.f32.xlu2 %v828_v50 }
 0x1dc   :  { %v3057_v57 = vpop.f32.mrf.mxu3  ;;  %v3088_v14 = vpop.eup %2457 }
 0x1dd   :  { %v822_v7 = vsel %vm809_vm1, %v3057_v57, -inf  ;;  %v909_v16 = vsel %vm809_vm1, %v3088_v14, 0.0 }
 0x1de   :  { %v3049_v53 = vpop.f32.mrf.mxu0  ;;  %907 = vadd.xlane.f32.xlu1 %v906_v52 }
 0x1df   :  { %v840_v54 = vsel %vm809_vm1, %v3049_v53, -inf }
 0x1e0   :  { %841 = vmax.xlane.f32.xlu0 %v840_v54  ;;  %817 = vmax.xlane.f32.xlu2 %v816_v55 }
 0x1e7   :  { %v3063_v60 = vpop.f32.mrf.mxu3 }
 0x1e8   :  { %v825_v17 = vsel %vm809_vm1, %v3063_v60, -inf }
 0x1ed   :  { %v3061_v59 = vpop.f32.mrf.mxu0 }
 0x1ee   :  { %v3055_v56 = vpop.f32.mrf.mxu1  ;;  %v846_v61 = vsel %vm809_vm1, %v3061_v59, -inf }
 0x1ef   :  { %v831_v58 = vsel %vm809_vm1, %v3055_v56, -inf  ;;  %v3078_v8 = vpop.f32.mrf.mxu3 }
 0x1f0   :  { %832 = vmax.xlane.f32.xlu2 %v831_v58  ;;  %v834_v11 = vsel %vm809_vm1, %v3078_v8, -inf }
 0x1f7   :  { %v3086_v13 = vpop.f32.mrf.mxu3 }
 0x1f8   :  { %847 = vmax.xlane.f32.xlu2 %v846_v61  ;;  %v837_v15 = vsel %vm809_vm1, %v3086_v13, -inf }
 0x1fd   :  { %v3067_v63 = vpop.f32.mrf.mxu0 }
 0x1fe   :  { %v3070_v2 = vpop.f32.mrf.mxu1  ;;  %v852_v5 = vsel %vm809_vm1, %v3067_v63, -inf }
 0x1ff   :  { %v843_v6 = vsel %vm809_vm1, %v3070_v2, -inf  ;;  %853 = vmax.xlane.f32.xlu1 %v852_v5  ;;  %v3102_v18 = vpop.f32.mrf.mxu3 }
 0x200   :  { %844 = vmax.xlane.f32.xlu0 %v843_v6  ;;  %823 = vmax.xlane.f32.xlu2 %v822_v7  ;;  %v849_v19 = vsel %vm809_vm1, %v3102_v18, -inf }
 0x206   :  { %v3080_v10 = vpop.f32.mrf.mxu1 }
 0x207   :  { %v855_v12 = vsel %vm809_vm1, %v3080_v10, -inf  ;;  %835 = vmax.xlane.f32.xlu1 %v834_v11 }
 0x208   :  { %856 = vmax.xlane.f32.xlu0 %v855_v12 }
 0x20f   :  { %838 = vmax.xlane.f32.xlu1 %v837_v15 }
 0x210   :  { %910 = vadd.xlane.f32.xlu0 %v909_v16 }
 0x218   :  { %2424 = vrot.lane.b32.xlu2 %v2997_v4, %s2841_s9  ;;  %826 = vmax.xlane.f32.xlu0 %v825_v17 }
 0x228   :  { %2419 = vrot.lane.b32.xlu1 %v2997_v4, %s2844_s21 }
 0x22c   :  { %2429 = vrot.lane.b32.xlu0 %v2997_v4, %s2845_s22 }
 0x241   :  { %850 = vmax.xlane.f32.xlu2 %v849_v19 }
 0x249   :  { %v821_v20 = vpop.xlane.xlu1 %820 }
 0x24a   :  { %v861_v4 = vsub.f32 %v3040_v47, %v821_v20 }
 0x24b   :  { %v830_v21 = vpop.xlane.xlu2 %829 }
 0x24c   :  { %v864_v22 = vsub.f32 %v590_v49, %v830_v21  ;;  %v880_v32 = vmul.f32 1.442695, %v861_v4 }
 0x24e   :  { %v886_v23 = vmul.f32 1.442695, %v864_v22 }
 0x250   :  { %2459 = vpow2.f32 %v886_v23 }
 0x251   :  { %v908_v24 = vpop.xlane.xlu1 %907 }
 0x252   :  { %2461 = vrcp.f32 %v908_v24 }
 0x253   :  { %v818_v25 = vpop.xlane.xlu2 %817  ;;  %v842_v35 = vpop.xlane.xlu0 %841 }
 0x254   :  { %v860_v26 = vsub.f32 %v3038_v45, %v818_v25  ;;  %v868_v39 = vsub.f32 %v3049_v53, %v842_v35 }
 0x256   :  { %v3107_v27 = vpop.eup %2459  ;;  %v878_v28 = vmul.f32 1.442695, %v860_v26  ;;  %v894_v42 = vmul.f32 1.442695, %v868_v39 }
 0x257   :  { %v924_v29 = vsel %vm809_vm1, %v3107_v27, 0.0 }
 0x258   :  { %v2462_v30 = vpop.eup %2461  ;;  %925 = vadd.xlane.f32.xlu0 %v924_v29  ;;  %2463 = vpow2.f32 %v878_v28 }
 0x259   :  { %v970_v31 = vmul.f32 %v2462_v30, %v3045_v51  ;;  %2465 = vpow2.f32 %v880_v32 }
 0x25b   :  { %2360 = vmatmul.msk.f32.vlgmr.msrb.gmra.mxu2 %vm809_vm1, %v970_v31 }
 0x25e   :  { %v3114_v33 = vpop.eup %2463 }
 0x25f   :  { %v912_v34 = vsel %vm809_vm1, %v3114_v33, 0.0  ;;  %v3119_v38 = vpop.eup %2465 }
 0x260   :  { %913 = vadd.xlane.f32.xlu2 %v912_v34  ;;  %v915_v41 = vsel %vm809_vm1, %v3119_v38, 0.0 }
 0x263   :  { %v833_v36 = vpop.xlane.xlu2 %832 }
 0x264   :  { %v865_v37 = vsub.f32 %v3055_v56, %v833_v36 }
 0x266   :  { %v888_v40 = vmul.f32 1.442695, %v865_v37 }
 0x268   :  { %2467 = vpow2.f32 %v888_v40  ;;  %916 = vadd.xlane.f32.xlu2 %v915_v41 }
 0x269   :  { %2469 = vpow2.f32 %v894_v42 }
 0x26b   :  { %v848_v43 = vpop.xlane.xlu2 %847 }
 0x26c   :  { %v870_v44 = vsub.f32 %v3061_v59, %v848_v43 }
 0x26e   :  { %v3125_v45 = vpop.eup %2467  ;;  %v898_v46 = vmul.f32 1.442695, %v870_v44 }
 0x26f   :  { %v927_v47 = vsel %vm809_vm1, %v3125_v45, 0.0  ;;  %v3130_v52 = vpop.eup %2469 }
 0x270   :  { %2471 = vpow2.f32 %v898_v46  ;;  %928 = vadd.xlane.f32.xlu0 %v927_v47  ;;  %v936_v61 = vsel %vm809_vm1, %v3130_v52, 0.0 }
 0x272   :  { %v854_v48 = vpop.xlane.xlu1 %853 }
 0x273   :  { %v845_v49 = vpop.xlane.xlu0 %844  ;;  %v872_v50 = vsub.f32 %v3067_v63, %v854_v48  ;;  %v824_v51 = vpop.xlane.xlu2 %823 }
 0x274   :  { %v869_v53 = vsub.f32 %v3070_v2, %v845_v49  ;;  %v862_v54 = vsub.f32 %v3057_v57, %v824_v51 }
 0x275   :  { %v902_v55 = vmul.f32 1.442695, %v872_v50 }
 0x276   :  { %v3134_v56 = vpop.eup %2471  ;;  %v896_v58 = vmul.f32 1.442695, %v869_v53  ;;  %v882_v59 = vmul.f32 1.442695, %v862_v54 }
 0x277   :  { %2473 = vpow2.f32 %v902_v55  ;;  %v942_v62 = vsel %vm809_vm1, %v3134_v56, 0.0 }
 0x278   :  { %2475 = vpow2.f32 %v896_v58  ;;  %937 = vadd.xlane.f32.xlu0 %v936_v61  ;;  %943 = vadd.xlane.f32.xlu1 %v942_v62 }
 0x279   :  { %2477 = vpow2.f32 %v882_v59 }
 0x27a   :  { %v836_v63 = vpop.xlane.xlu1 %835 }
 0x27b   :  { %v857_v0 = vpop.xlane.xlu0 %856  ;;  %v2425_v2 = vpop.permute.xlu2 %2424  ;;  %v866_v57 = vsub.f32 %v3078_v8, %v836_v63 }
 0x27c   :  { %v2426_v5 = vunpack.i.l.bf16 %v2425_v2  ;;  %v2427_v26 = vunpack.i.h.bf16 %v2425_v2 }
 0x27d   :  { %v3141_v6 = vpop.eup %2473  ;;  %v890_v7 = vmul.f32 1.442695, %v866_v57 }
 0x27e   :  { %v3143_v9 = vpop.eup %2475  ;;  %1188 = vmatpush.msrb.mxu2 %v2426_v5  ;;  %v948_v11 = vsel %vm809_vm1, %v3141_v6, 0.0 }
 0x27f   :  { %v3147_v12 = vpop.eup %2477  ;;  %2479 = vpow2.f32 %v890_v7  ;;  %v939_v15 = vsel %vm809_vm1, %v3143_v9, 0.0  ;;  %949 = vadd.xlane.f32.xlu2 %v948_v11 }
 0x280   :  { %940 = vadd.xlane.f32.xlu0 %v939_v15  ;;  %v918_v8 = vsel %vm809_vm1, %v3147_v12, 0.0 }
 0x281   :  { %919 = vadd.xlane.f32.xlu1 %v918_v8 }
 0x282   :  { %v839_v16 = vpop.xlane.xlu1 %838 }
 0x283   :  { %v911_v17 = vpop.xlane.xlu0 %910  ;;  %v867_v19 = vsub.f32 %v3086_v13, %v839_v16  ;;  %v873_v13 = vsub.f32 %v3080_v10, %v857_v0 }
 0x284   :  { %2481 = vrcp.f32 %v911_v17 }
 0x285   :  { %v3154_v20 = vpop.eup %2479  ;;  %v892_v21 = vmul.f32 1.442695, %v867_v19  ;;  %v904_v31 = vmul.f32 1.442695, %v873_v13 }
 0x286   :  { %v930_v22 = vsel %vm809_vm1, %v3154_v20, 0.0 }
 0x287   :  { %2483 = vpow2.f32 %v892_v21 }
 0x288   :  { %931 = vadd.xlane.f32.xlu0 %v930_v22 }
 0x28a   :  { %v2482_v23 = vpop.eup %2481 }
 0x28b   :  { %v971_v24 = vmul.f32 %v2482_v23, %v3088_v14  ;;  %v827_v25 = vpop.xlane.xlu0 %826 }
 0x28c   :  { %v863_v28 = vsub.f32 %v3063_v60, %v827_v25 }
 0x28d   :  { %v3160_v4 = vpop.eup %2483  ;;  %2361 = vmatmul.msk.f32.vlgmr.msrb.gmra.mxu3 %vm809_vm1, %v971_v24 }
 0x28e   :  { %v884_v29 = vmul.f32 1.442695, %v863_v28  ;;  %1211 = vmatpush.msrb.mxu3 %v2427_v26  ;;  %v933_v30 = vsel %vm809_vm1, %v3160_v4, 0.0 }
 0x290   :  { %2485 = vpow2.f32 %v884_v29  ;;  %934 = vadd.xlane.f32.xlu0 %v933_v30 }
 0x291   :  { %2487 = vpow2.f32 %v904_v31 }
 0x296   :  { %v3166_v32 = vpop.eup %2485 }
 0x297   :  { %v921_v60 = vsel %vm809_vm1, %v3166_v32, 0.0  ;;  %v3172_v35 = vpop.eup %2487 }
 0x298   :  { %922 = vadd.xlane.f32.xlu2 %v921_v60  ;;  %v951_v36 = vsel %vm809_vm1, %v3172_v35, 0.0 }
 0x29a   :  { %412 = vrot.lane.b32.xlu1 %v2981_v1, %s2838_s6  ;;  %v2420_v14 = vpop.permute.xlu1 %2419 }
 0x29b   :  { %v2422_v10 = vunpack.i.h.bf16 %v2420_v14  ;;  %v2421_v34 = vunpack.i.l.bf16 %v2420_v14 }
 0x29d   :  { %1142 = vmatpush.msra.mxu0 %v2421_v34  ;;  %1165 = vmatpush.msrb.mxu1 %v2422_v10 }
 0x29e   :  { %v2430_v43 = vpop.permute.xlu0 %2429 }
 0x29f   :  { %v2431_v48 = vunpack.i.l.bf16 %v2430_v43  ;;  %v2432_v54 = vunpack.i.h.bf16 %v2430_v43 }
 0x2a0   :  { %952 = vadd.xlane.f32.xlu2 %v951_v36 }
 0x2a2   :  { %414 = vrot.lane.b32.xlu1 %v2992_v3, %s2838_s6 }
 0x2aa   :  { %420 = vrot.lane.b32.xlu1 %v2992_v3, %s2846_s0 }
 0x2b4   :  { %v851_v37 = vpop.xlane.xlu2 %850 }
 0x2b5   :  { %v871_v39 = vsub.f32 %v3102_v18, %v851_v37 }
 0x2b7   :  { %v900_v40 = vmul.f32 1.442695, %v871_v39 }
 0x2b8   :  { %418 = vrot.lane.b32.xlu2 %v2981_v1, %s2846_s0 }
 0x2b9   :  { %2489 = vpow2.f32 %v900_v40 }
 0x2bf   :  { %v3183_v41 = vpop.eup %2489 }
 0x2c0   :  { %v945_v42 = vsel %vm809_vm1, %v3183_v41, 0.0 }
 0x2c1   :  { %946 = vadd.xlane.f32.xlu0 %v945_v42 }
 0x2cb   :  { %v926_v46 = vpop.xlane.xlu0 %925 }
 0x2d3   :  { %v914_v44 = vpop.xlane.xlu2 %913 }
 0x2d4   :  { %2491 = vrcp.f32 %v914_v44 }
 0x2d5   :  { %2493 = vrcp.f32 %v926_v46 }
 0x2da   :  { %v2492_v47 = vpop.eup %2491 }
 0x2db   :  { %v972_v3 = vmul.f32 %v2492_v47, %v3114_v33  ;;  %v917_v18 = vpop.xlane.xlu2 %916  ;;  %v2494_v1 = vpop.eup %2493 }
 0x2dc   :  { %2495 = vrcp.f32 %v917_v18  ;;  %v976_v51 = vmul.f32 %v2494_v1, %v3107_v27  ;;  %v1444_v18 = vld [vmem:[#allocation8 + $0x70] sm:$0xff]  ;;  %v1443_v1 = vld [vmem:[#allocation8 + $0x68] sm:$0xff] }
 0x2dd   :  { %2362 = vmatmul.msk.f32.vlgmr.msrb.gmra.mxu0 %vm809_vm1, %v972_v3  ;;  %v1445_v3 = vld [vmem:[#allocation8 + $0x78] sm:$0xff] }
 0x2de   :  { %1234 = vmatpush.msrb.mxu0 %v2431_v48  ;;  %v1006_v34 = vpop.f32.mrf.mxu2 }
 0x2e2   :  { %v2496_v49 = vpop.eup %2495 }
 0x2e3   :  { %v929_v50 = vpop.xlane.xlu0 %928  ;;  %v973_v53 = vmul.f32 %v2496_v49, %v3119_v38  ;;  %v1442_v49 = vld [vmem:[#allocation8 + $0x60] sm:$0xff] }
 0x2e4   :  { %2497 = vrcp.f32 %v929_v50  ;;  %v1441_v50 = vld [vmem:[#allocation8 + $0x58] sm:$0xff] }
 0x2e5   :  { %2363 = vmatmul.msk.f32.vlgmr.msra.gmra.mxu1 %vm809_vm1, %v973_v53  ;;  %2366 = vmatmul.msk.f32.vlgmr.msra.gmra.mxu0 %vm809_vm1, %v976_v51  ;;  %v1440_v51 = vld [vmem:[#allocation8 + $0x50] sm:$0xff]  ;;  %v1439_v53 = vld [vmem:[#allocation8 + $0x48] sm:$0xff] }
 0x2e6   :  { %1257 = vmatpush.msra.mxu1 %v2432_v54  ;;  %v1438_v54 = vld [vmem:[#allocation8 + $0x40] sm:$0xff] }
 0x2ea   :  { %v2498_v33 = vpop.eup %2497 }
 0x2eb   :  { %v977_v55 = vmul.f32 %v2498_v33, %v3125_v45  ;;  %v938_v58 = vpop.xlane.xlu0 %937  ;;  %v944_v59 = vpop.xlane.xlu1 %943  ;;  %v1437_v33 = vld [vmem:[#allocation8 + $0x38] sm:$0xff] }
 0x2ec   :  { %2499 = vrcp.f32 %v938_v58  ;;  %v1435_v58 = vld [vmem:[#allocation8 + $0x28] sm:$0xff] }
 0x2ed   :  { %2367 = vmatmul.msk.f32.vlgmr.msrb.gmra.mxu1 %vm809_vm1, %v977_v55  ;;  %v1436_v55 = vld [vmem:[#allocation8 + $0x30] sm:$0xff] }
 0x2f2   :  { %v2500_v61 = vpop.eup %2499 }
 0x2f3   :  { %v980_v27 = vmul.f32 %v2500_v61, %v3130_v52  ;;  %v941_v62 = vpop.xlane.xlu0 %940  ;;  %v950_v52 = vpop.xlane.xlu2 %949  ;;  %v1433_v61 = vld [vmem:[#allocation8 + $0x18] sm:$0xff] }
 0x2f4   :  { %2501 = vrcp.f32 %v941_v62  ;;  %v920_v38 = vpop.xlane.xlu1 %919  ;;  %v1431_v62 = vld [vmem:[#allocation8 + $0x8] sm:$0xff] }
 0x2f5   :  { %2503 = vrcp.f32 %v920_v38  ;;  %2370 = vmatmul.msk.f32.vlgmr.msrb.gmra.mxu0 %vm809_vm1, %v980_v27  ;;  %v1432_v27 = vld [vmem:[#allocation8 + $0x10] sm:$0xff]  ;;  %v1430_v38 = vld [vmem:[#allocation8] sm:$0xff] }
 0x2fa   :  { %v2502_v63 = vpop.eup %2501 }
 0x2fb   :  { %v2504_v0 = vpop.eup %2503  ;;  %v981_v2 = vmul.f32 %v2502_v63, %v3143_v9  ;;  %v932_v57 = vpop.xlane.xlu0 %931 }
 0x2fc   :  { %v974_v45 = vmul.f32 %v2504_v0, %v3147_v12  ;;  %2505 = vrcp.f32 %v932_v57 }
 0x2fd   :  { %2371 = vmatmul.msk.f32.vlgmr.msra.gmra.mxu1 %vm809_vm1, %v981_v2  ;;  %2507 = vrcp.f32 %v944_v59  ;;  %v1434_v59 = vld [vmem:[#allocation8 + $0x20] sm:$0xff] }
 0x2fe   :  { %2364 = vmatmul.msk.f32.vlgmr.msra.gmra.mxu2 %vm809_vm1, %v974_v45 }
 0x302   :  { %v2506_v5 = vpop.eup %2505 }
 0x303   :  { %v978_v7 = vmul.f32 %v2506_v5, %v3154_v20  ;;  %v2508_v11 = vpop.eup %2507  ;;  %v935_v12 = vpop.xlane.xlu0 %934 }
 0x304   :  { %v982_v8 = vmul.f32 %v2508_v11, %v3134_v56 }
 0x306   :  { %2368 = vmatmul.msk.f32.vlgmr.msrb.gmra.mxu2 %vm809_vm1, %v978_v7 }
 0x30b   :  { %v923_v15 = vpop.xlane.xlu2 %922 }
 0x30c   :  { %v413_v9 = vpop.permute.xlu1 %412  ;;  %2509 = vrcp.f32 %v923_v15 }
 0x30d   :  { %1280 = vmatpush.msra.mxu2 %v413_v9  ;;  %2511 = vrcp.f32 %v935_v12 }
 0x30e   :  { %2372 = vmatmul.msk.f32.vlgmr.msra.gmra.mxu2 %vm809_vm1, %v982_v8  ;;  %2513 = vrcp.f32 %v950_v52 }
 0x30f   :  { %1450 = vmatpush.msrb.mxu2 %v1445_v3 }
 0x310   :  { %v3219_v39 = vpop.f32.mrf.mxu3 }
 0x311   :  { %1451 = vmatpush.msrb.mxu2 %v1444_v18 }
 0x312   :  { %v2510_v16 = vpop.eup %2509 }
 0x313   :  { %v975_v17 = vmul.f32 %v2510_v16, %v3166_v32  ;;  %v953_v19 = vpop.xlane.xlu2 %952  ;;  %v2512_v20 = vpop.eup %2511  ;;  %1452 = vmatpush.msrb.mxu2 %v1443_v1 }
 0x314   :  { %v415_v21 = vpop.permute.xlu1 %414  ;;  %2515 = vrcp.f32 %v953_v19  ;;  %v2514_v22 = vpop.eup %2513  ;;  %v979_v23 = vmul.f32 %v2512_v20, %v3160_v4 }
 0x315   :  { %2365 = vmatmul.msk.f32.vlgmr.msra.gmra.mxu3 %vm809_vm1, %v975_v17  ;;  %v984_v26 = vmul.f32 %v2514_v22, %v3141_v6  ;;  %1453 = vmatpush.msrb.mxu2 %v1442_v49 }
 0x316   :  { %1303 = vmatpush.msra.mxu3 %v415_v21 }
 0x317   :  { %1454 = vmatpush.msrb.mxu2 %v1441_v50 }
 0x319   :  { %1455 = vmatpush.msrb.mxu2 %v1440_v51 }
 0x31a   :  { %v2516_v56 = vpop.eup %2515 }
 0x31b   :  { %v985_v24 = vmul.f32 %v2516_v56, %v3172_v35  ;;  %v419_v25 = vpop.permute.xlu2 %418  ;;  %1456 = vmatpush.msrb.mxu2 %v1439_v53 }
 0x31c   :  { %v421_v28 = vpop.permute.xlu1 %420  ;;  %1326 = vmatpush.msra.mxu0 %v419_v25 }
 0x31d   :  { %1349 = vmatpush.msrb.mxu1 %v421_v28  ;;  %2369 = vmatmul.msk.f32.vlgmr.msrb.gmra.mxu3 %vm809_vm1, %v979_v23 }
 0x31e   :  { %2374 = vmatmul.msk.f32.vlgmr.msra.gmra.mxu0 %vm809_vm1, %v984_v26  ;;  %2375 = vmatmul.msk.f32.vlgmr.msrb.gmra.mxu1 %vm809_vm1, %v985_v24 }
 0x31f   :  { %1457 = vmatpush.msrb.mxu2 %v1438_v54 }
 0x321   :  { %1458 = vmatpush.msrb.mxu2 %v1437_v33 }
 0x323   :  { %1459 = vmatpush.msrb.mxu2 %v1436_v55 }
 0x325   :  { %1460 = vmatpush.msrb.mxu2 %v1435_v58 }
 0x327   :  { %1461 = vmatpush.msrb.mxu2 %v1434_v59 }
 0x329   :  { %1462 = vmatpush.msrb.mxu2 %v1433_v61 }
 0x32b   :  { %1463 = vmatpush.msrb.mxu2 %v1432_v27 }
 0x32d   :  { %1464 = vmatpush.msrb.mxu2 %v1431_v62 }
 0x32f   :  { %1465 = vmatpush.msrb.mxu2 %v1430_v38 }
 0x334   :  { %v947_v13 = vpop.xlane.xlu0 %946 }
 0x335   :  { %2517 = vrcp.f32 %v947_v13 }
 0x33b   :  { %v2518_v29 = vpop.eup %2517 }
 0x33c   :  { %v983_v30 = vmul.f32 %v2518_v29, %v3183_v41 }
 0x33e   :  { %2373 = vmatmul.msk.f32.vlgmr.msra.gmra.mxu3 %vm809_vm1, %v983_v30 }
 0x35a   :  { %v1052_v4 = vpop.f32.mrf.mxu0 }
 0x362   :  { %v1075_v31 = vpop.f32.mrf.mxu1  ;;  %v1144_v6 = vpop.f32.mrf.mxu0 }
 0x363   :  { %v2433_v32 = vpack.i.bf16 %v1075_v31, %v1052_v4 }
 0x365   :  { %2434 = vrot.lane.b32.xlu0 %v2433_v32, %s2846_s0 }
 0x36a   :  { %v1167_v60 = vpop.f32.mrf.mxu1 }
 0x36b   :  { %v2438_v14 = vpack.i.bf16 %v1167_v60, %v1144_v6  ;;  %v2453_v60 = vld [vmem:[%s3596_s4] ss:$0 sm:$0xff] }
 0x36d   :  { %2439 = vrot.lane.b32.xlu2 %v2438_v14, %s2845_s22 }
 0x372   :  { %v1236_v10 = vpop.f32.mrf.mxu0 }
 0x375   :  { %1388 = vrot.lane.b32.xlu2 %v1236_v10, %s2844_s21 }
 0x37a   :  { %v1259_v35 = vpop.f32.mrf.mxu1 }
 0x37d   :  { %1390 = vrot.lane.b32.xlu2 %v1259_v35, %s2844_s21 }
 0x381   :  { %v1098_v36 = vpop.f32.mrf.mxu2 }
 0x389   :  { %v1190_v37 = vpop.f32.mrf.mxu2 }
 0x391   :  { %v1282_v40 = vpop.f32.mrf.mxu2 }
 0x392   :  { %1396 = vrot.lane.b32.xlu0 %v1282_v40, %s2842_s12 }
 0x398   :  { %v1121_v41 = vpop.f32.mrf.mxu3 }
 0x399   :  { %v2443_v42 = vpack.i.bf16 %v1121_v41, %v1098_v36  ;;  %v2847_v41 = vmov 1024.0  }
 0x39a   :  { %2519 = vrcp.f32 %v2847_v41  ;;  %v1577_v41 = vld [vmem:[#allocation13 + $0xc8] sm:$0xff] }
 0x39b   :  { %2444 = vrot.lane.b32.xlu1 %v2443_v42, %s2838_s6  ;;  %v1328_v46 = vpop.f32.mrf.mxu0  ;;  %v1351_v47 = vpop.f32.mrf.mxu1 }
 0x3a0   :  { %v1213_v43 = vpop.f32.mrf.mxu3  ;;  %v2520_v42 = vpop.eup %2519 }
 0x3a1   :  { %v2448_v44 = vpack.i.bf16 %v1213_v43, %v1190_v37  ;;  %v1494_v43 = vmul.f32 1024.0, %v2520_v42  ;;  %vm1498_vm8 = vweird.f32 %v2520_v42 }
 0x3a3   :  { %2449 = vrot.lane.b32.xlu1 %v2448_v44, %s2841_s9  ;;  %v1495_v44 = vsub.f32 1.0, %v1494_v43  ;;  %v1579_v43 = vld [vmem:[#allocation13 + $0xd8] sm:$0xff] }
 0x3a5   :  { %v1496_v3 = vmul.f32 %v2520_v42, %v1495_v44  ;;  %v1572_v44 = vld [vmem:[#allocation13 + $0xa0] sm:$0xff] }
 0x3a7   :  { %v1497_v1 = vadd.f32 %v2520_v42, %v1496_v3 }
 0x3a9   :  { %v3245_v51 = vsel %vm1498_vm8, %v2520_v42, %v1497_v1  ;;  %v1578_v42 = vld [vmem:[#allocation13 + $0xd0] sm:$0xff]  ;;  %v1568_v1 = vld [vmem:[#allocation13 + $0x80] sm:$0xff] }
 0x3ab   :  { %1404 = vrot.lane.b32.xlu1 %v1328_v46, %s2843_s20 }
 0x3b3   :  { %1406 = vrot.lane.b32.xlu1 %v1351_v47, %s2843_s20 }
 0x3c1   :  { %v1305_v48 = vpop.f32.mrf.mxu3 }
 0x3c2   :  { %1398 = vrot.lane.b32.xlu0 %v1305_v48, %s2842_s12 }
 0x3c7   :  { %v2440_v2 = vpop.permute.xlu2 %2439 }
 0x3c8   :  { %v2441_v7 = vunpack.i.l.bf16 %v2440_v2  ;;  %v2442_v26 = vunpack.i.h.bf16 %v2440_v2 }
 0x3cf   :  { %v1389_v12 = vpop.permute.xlu2 %1388 }
 0x3d7   :  { %v2435_v63 = vpop.permute.xlu0 %2434  ;;  %v1391_v29 = vpop.permute.xlu2 %1390 }
 0x3d8   :  { %v2436_v57 = vunpack.i.l.bf16 %v2435_v63  ;;  %v2437_v22 = vunpack.i.h.bf16 %v2435_v63 }
 0x3da   :  { %v1410_v5 = vsel %vm424_vm0, %v1006_v34, %v2436_v57  ;;  %v1411_v23 = vsel %vm424_vm0, %v3219_v39, %v2437_v22  ;;  %v2545_v34 = vld [vmem:[#allocation2] sm:$0xff]  ;;  %v2546_v39 = vld [vmem:[#allocation2 + $0x8] sm:$0xff]  ;;  %v1602_v22 = vld [vmem:[#allocation13 + $0x190] sm:$0xff] }
 0x404   :  { %v1397_v17 = vpop.permute.xlu0 %1396 }
 0x40d   :  { %v2445_v0 = vpop.permute.xlu1 %2444 }
 0x40e   :  { %v2446_v45 = vunpack.i.l.bf16 %v2445_v0  ;;  %v2447_v56 = vunpack.i.h.bf16 %v2445_v0 }
 0x410   :  { %v1413_v52 = vsel %vm1412_vm2, %v1410_v5, %v2446_v45  ;;  %v1414_v24 = vsel %vm1412_vm2, %v1411_v23, %v2447_v56  ;;  %v1612_v45 = vld [vmem:[#allocation13 + $0x1e0] sm:$0xff]  ;;  %v1613_v5 = vld [vmem:[#allocation13 + $0x1e8] sm:$0xff]  ;;  %v1603_v56 = vld [vmem:[#allocation13 + $0x198] sm:$0xff] }
 0x411   :  { %v1416_v8 = vsel %vm1415_vm3, %v1413_v52, %v2441_v7  ;;  %v1417_v28 = vsel %vm1415_vm3, %v1414_v24, %v2442_v26  ;;  %v1614_v52 = vld [vmem:[#allocation13 + $0x1f0] sm:$0xff]  ;;  %1626 = vmatpush.msrb.mxu3 %v1612_v45  ;;  %1649 = vmatpush.msrb.mxu0 %v1613_v5  ;;  %v1615_v7 = vld [vmem:[#allocation13 + $0x1f8] sm:$0xff]  ;;  %v1596_v23 = vld [vmem:[#allocation13 + $0x160] sm:$0xff] }
 0x412   :  { %1672 = vmatpush.msra.mxu1 %v1614_v52  ;;  %1695 = vmatpush.msra.mxu2 %v1615_v7  ;;  %v1597_v24 = vld [vmem:[#allocation13 + $0x168] sm:$0xff]  ;;  %v1599_v26 = vld [vmem:[#allocation13 + $0x178] sm:$0xff]  ;;  %v1556_v45 = vld [vmem:[#allocation13 + $0x20] sm:$0xff] }
 0x413   :  { %v1557_v5 = vld [vmem:[#allocation13 + $0x28] sm:$0xff]  ;;  %v1558_v52 = vld [vmem:[#allocation13 + $0x30] sm:$0xff]  ;;  %v1559_v7 = vld [vmem:[#allocation13 + $0x38] sm:$0xff] }
 0x415   :  { %v2450_v11 = vpop.permute.xlu1 %2449 }
 0x416   :  { %v2451_v15 = vunpack.i.l.bf16 %v2450_v11  ;;  %v2452_v25 = vunpack.i.h.bf16 %v2450_v11  ;;  %v1608_v11 = vld [vmem:[#allocation13 + $0x1c0] sm:$0xff] }
 0x417   :  { %1627 = vmatpush.msrb.mxu3 %v1608_v11 }
 0x418   :  { %v1419_v9 = vsel %vm1418_vm4, %v1416_v8, %v2451_v15  ;;  %v1420_v13 = vsel %vm1418_vm4, %v1417_v28, %v2452_v25  ;;  %v1609_v15 = vld [vmem:[#allocation13 + $0x1c8] sm:$0xff]  ;;  %v1610_v8 = vld [vmem:[#allocation13 + $0x1d0] sm:$0xff]  ;;  %v1592_v28 = vld [vmem:[#allocation13 + $0x140] sm:$0xff] }
 0x419   :  { %v1422_v16 = vsel %vm1421_vm5, %v1419_v9, %v1389_v12  ;;  %v1423_v4 = vsel %vm1421_vm5, %v1420_v13, %v1391_v29  ;;  %1650 = vmatpush.msrb.mxu0 %v1609_v15  ;;  %v1611_v9 = vld [vmem:[#allocation13 + $0x1d8] sm:$0xff]  ;;  %1673 = vmatpush.msra.mxu1 %v1610_v8  ;;  %v1604_v12 = vld [vmem:[#allocation13 + $0x1a0] sm:$0xff]  ;;  %v1598_v25 = vld [vmem:[#allocation13 + $0x170] sm:$0xff] }
 0x41a   :  { %v1425_v21 = vsel %vm1424_vm6, %v1422_v16, %v1397_v17  ;;  %1696 = vmatpush.msra.mxu2 %v1611_v9  ;;  %v1605_v16 = vld [vmem:[#allocation13 + $0x1a8] sm:$0xff]  ;;  %v1606_v17 = vld [vmem:[#allocation13 + $0x1b0] sm:$0xff]  ;;  %1628 = vmatpush.msrb.mxu3 %v1604_v12  ;;  %v1552_v15 = vld [vmem:[#allocation13] sm:$0xff] }
 0x41b   :  { %1651 = vmatpush.msrb.mxu0 %v1605_v16  ;;  %1674 = vmatpush.msra.mxu1 %v1606_v17  ;;  %v1593_v13 = vld [vmem:[#allocation13 + $0x148] sm:$0xff]  ;;  %v1594_v29 = vld [vmem:[#allocation13 + $0x150] sm:$0xff]  ;;  %v1555_v12 = vld [vmem:[#allocation13 + $0x18] sm:$0xff] }
 0x41c   :  { %v1553_v8 = vld [vmem:[#allocation13 + $0x8] sm:$0xff]  ;;  %v1554_v9 = vld [vmem:[#allocation13 + $0x10] sm:$0xff] }
 0x41d   :  { %v1405_v19 = vpop.permute.xlu1 %1404  ;;  %1675 = vmatpush.msra.mxu1 %v1602_v22 }
 0x41e   :  { %v1428_v20 = vsel %vm1427_vm7, %v1425_v21, %v1405_v19  ;;  %v1607_v19 = vld [vmem:[#allocation13 + $0x1b8] sm:$0xff]  ;;  %v1600_v21 = vld [vmem:[#allocation13 + $0x180] sm:$0xff] }
 0x41f   :  { %1466 = vmatmul.f32.vlgmr.msrb.gmra.mxu2 %v1428_v20  ;;  %v1601_v20 = vld [vmem:[#allocation13 + $0x188] sm:$0xff]  ;;  %1629 = vmatpush.msrb.mxu3 %v1600_v21 }
 0x420   :  { %1697 = vmatpush.msra.mxu2 %v1607_v19  ;;  %1652 = vmatpush.msrb.mxu0 %v1601_v20 }
 0x421   :  { %1630 = vmatpush.msrb.mxu3 %v1596_v23  ;;  %1676 = vmatpush.msra.mxu1 %v1598_v25 }
 0x422   :  { %1698 = vmatpush.msra.mxu2 %v1603_v56  ;;  %1653 = vmatpush.msrb.mxu0 %v1597_v24 }
 0x423   :  { %1631 = vmatpush.msrb.mxu3 %v1592_v28  ;;  %1677 = vmatpush.msra.mxu1 %v1594_v29 }
 0x424   :  { %1699 = vmatpush.msra.mxu2 %v1599_v26  ;;  %1654 = vmatpush.msrb.mxu0 %v1593_v13 }
 0x425   :  { %v1407_v31 = vpop.permute.xlu1 %1406 }
 0x434   :  { %v1399_v30 = vpop.permute.xlu0 %1398 }
 0x435   :  { %v1426_v32 = vsel %vm1424_vm6, %v1423_v4, %v1399_v30  ;;  %v1595_v30 = vld [vmem:[#allocation13 + $0x158] sm:$0xff]  ;;  %v1588_v4 = vld [vmem:[#allocation13 + $0x120] sm:$0xff] }
 0x436   :  { %v1429_v6 = vsel %vm1427_vm7, %v1426_v32, %v1407_v31  ;;  %1700 = vmatpush.msra.mxu2 %v1595_v30  ;;  %v1589_v31 = vld [vmem:[#allocation13 + $0x128] sm:$0xff]  ;;  %v1590_v32 = vld [vmem:[#allocation13 + $0x130] sm:$0xff]  ;;  %1632 = vmatpush.msrb.mxu3 %v1588_v4 }
 0x437   :  { %1469 = vmatmul.f32.gmra.mxu2 %v1429_v6  ;;  %1655 = vmatpush.msrb.mxu0 %v1589_v31  ;;  %v1591_v6 = vld [vmem:[#allocation13 + $0x138] sm:$0xff]  ;;  %v1475_v31 = vld [vmem:[#allocation10] sm:$0xff] }
 0x438   :  { %1678 = vmatpush.msra.mxu1 %v1590_v32  ;;  %1701 = vmatpush.msra.mxu2 %v1591_v6 }
 0x4a2   :  { %v1467_v14 = vpop.f32.mrf.mxu2 }
 0x4a3   :  { %v1468_v10 = vadd.f32 %v2453_v60, %v1467_v14  ;;  %v1585_v14 = vld [vmem:[#allocation13 + $0x108] sm:$0xff] }
 0x4a4   :  { %1656 = vmatpush.msrb.mxu0 %v1585_v14 }
 0x4a5   :  { %v1473_v35 = vadd.f32 %v2545_v34, %v1468_v10  ;;  %v1586_v10 = vld [vmem:[#allocation13 + $0x110] sm:$0xff]  ;;  %v1587_v34 = vld [vmem:[#allocation13 + $0x118] sm:$0xff] }
 0x4a6   :  { %1679 = vmatpush.msra.mxu1 %v1586_v10  ;;  %1702 = vmatpush.msra.mxu2 %v1587_v34 }
 0x4a7   :  { %1477 = vadd.xlane.f32.xlu2 %v1473_v35 }
 0x4ba   :  { %v1470_v36 = vpop.f32.mrf.mxu2 }
 0x4bb   :  { %v1471_v37 = vadd.f32 %v2453_v60, %v1470_v36  ;;  %v1584_v60 = vld [vmem:[#allocation13 + $0x100] sm:$0xff]  ;;  %v1581_v36 = vld [vmem:[#allocation13 + $0xe8] sm:$0xff] }
 0x4bc   :  { %1633 = vmatpush.msrb.mxu3 %v1584_v60  ;;  %1657 = vmatpush.msrb.mxu0 %v1581_v36  ;;  %v1476_v60 = vld [vmem:[#allocation11] sm:$0xff] }
 0x4bd   :  { %v1474_v40 = vadd.f32 %v2546_v39, %v1471_v37  ;;  %v1582_v37 = vld [vmem:[#allocation13 + $0xf0] sm:$0xff]  ;;  %v1583_v39 = vld [vmem:[#allocation13 + $0xf8] sm:$0xff] }
 0x4be   :  { %1680 = vmatpush.msra.mxu1 %v1582_v37  ;;  %1703 = vmatpush.msra.mxu2 %v1583_v39 }
 0x4bf   :  { %1479 = vadd.xlane.f32.xlu0 %v1474_v40  ;;  %1658 = vmatpush.msrb.mxu0 %v1577_v41 }
 0x4c0   :  { %1681 = vmatpush.msra.mxu1 %v1578_v42  ;;  %1704 = vmatpush.msra.mxu2 %v1579_v43 }
 0x51a   :  { %v1478_v46 = vpop.xlane.xlu2 %1477 }
 0x51b   :  { %v1481_v47 = vrot.slane %v1478_v46, 4 }
 0x51d   :  { %v1482_v18 = vadd.f32 %v1481_v47, %v1478_v46  ;;  %v1573_v46 = vld [vmem:[#allocation13 + $0xa8] sm:$0xff]  ;;  %v1574_v47 = vld [vmem:[#allocation13 + $0xb0] sm:$0xff] }
 0x51e   :  { %1659 = vmatpush.msrb.mxu0 %v1573_v46  ;;  %1682 = vmatpush.msra.mxu1 %v1574_v47  ;;  %v3273_v47 = vld [vmem:[#allocation14] sm:$0xf] }
 0x51f   :  { %v1483_v48 = vrot.slane %v1482_v18, 2 }
 0x521   :  { %v1484_v49 = vadd.f32 %v1483_v48, %v1482_v18  ;;  %v1575_v18 = vld [vmem:[#allocation13 + $0xb8] sm:$0xff] }
 0x522   :  { %1705 = vmatpush.msra.mxu2 %v1575_v18  ;;  %v1620_v18 = vperm.slane %v3273_v47, 2 }
 0x523   :  { %v1485_v50 = vrot.slane %v1484_v49, 1 }
 0x525   :  { %v1486_v53 = vadd.f32 %v1485_v50, %v1484_v49  ;;  %v1569_v49 = vld [vmem:[#allocation13 + $0x88] sm:$0xff]  ;;  %v1570_v50 = vld [vmem:[#allocation13 + $0x90] sm:$0xff] }
 0x526   :  { %1660 = vmatpush.msrb.mxu0 %v1569_v49  ;;  %1683 = vmatpush.msra.mxu1 %v1570_v50 }
 0x527   :  { %v1500_v54 = vmul.f32 %v3245_v51, %v1486_v53  ;;  %v1571_v53 = vld [vmem:[#allocation13 + $0x98] sm:$0xff] }
 0x528   :  { %1706 = vmatpush.msra.mxu2 %v1571_v53  ;;  %v1618_v53 = vperm.slane %v3273_v47, 0 }
 0x529   :  { %v3248_v33 = vsub.f32 %v1473_v35, %v1500_v54  ;;  %v1580_v35 = vld [vmem:[#allocation13 + $0xe0] sm:$0xff] }
 0x52a   :  { %1634 = vmatpush.msrb.mxu3 %v1580_v35 }
 0x52b   :  { %v1504_v55 = vmul.f32 %v3248_v33, %v3248_v33 }
 0x52d   :  { %1506 = vadd.xlane.f32.xlu1 %v1504_v55  ;;  %v1564_v55 = vld [vmem:[#allocation13 + $0x60] sm:$0xff] }
 0x532   :  { %v1480_v58 = vpop.xlane.xlu0 %1479 }
 0x533   :  { %v1487_v59 = vrot.slane %v1480_v58, 4 }
 0x535   :  { %v1488_v61 = vadd.f32 %v1487_v59, %v1480_v58  ;;  %v1565_v58 = vld [vmem:[#allocation13 + $0x68] sm:$0xff]  ;;  %v1566_v59 = vld [vmem:[#allocation13 + $0x70] sm:$0xff] }
 0x536   :  { %1661 = vmatpush.msrb.mxu0 %v1565_v58  ;;  %1684 = vmatpush.msra.mxu1 %v1566_v59  ;;  %v1621_v59 = vperm.slane %v3273_v47, 3 }
 0x537   :  { %v1489_v27 = vrot.slane %v1488_v61, 2 }
 0x539   :  { %v1490_v62 = vadd.f32 %v1489_v27, %v1488_v61  ;;  %v1567_v61 = vld [vmem:[#allocation13 + $0x78] sm:$0xff] }
 0x53a   :  { %1707 = vmatpush.msra.mxu2 %v1567_v61 }
 0x53b   :  { %v1491_v38 = vrot.slane %v1490_v62, 1 }
 0x53d   :  { %v1492_v63 = vadd.f32 %v1491_v38, %v1490_v62  ;;  %v1560_v62 = vld [vmem:[#allocation13 + $0x40] sm:$0xff]  ;;  %v1561_v38 = vld [vmem:[#allocation13 + $0x48] sm:$0xff] }
 0x53e   :  { %1662 = vmatpush.msrb.mxu0 %v1561_v38  ;;  %v2100_v38 = vld [vmem:[#allocation16 + $0xf0] sm:$0xff] }
 0x53f   :  { %v1501_v0 = vmul.f32 %v3245_v51, %v1492_v63  ;;  %v1562_v63 = vld [vmem:[#allocation13 + $0x50] sm:$0xff] }
 0x540   :  { %1685 = vmatpush.msra.mxu1 %v1562_v63  ;;  %1663 = vmatpush.msrb.mxu0 %v1557_v5  ;;  %v2116_v63 = vld [vmem:[#allocation16 + $0x170] sm:$0xff] }
 0x541   :  { %v3253_v2 = vsub.f32 %v1474_v40, %v1501_v0  ;;  %v1576_v40 = vld [vmem:[#allocation13 + $0xc0] sm:$0xff]  ;;  %v1563_v0 = vld [vmem:[#allocation13 + $0x58] sm:$0xff] }
 0x542   :  { %1635 = vmatpush.msrb.mxu3 %v1576_v40  ;;  %1708 = vmatpush.msra.mxu2 %v1563_v0 }
 0x543   :  { %v1505_v57 = vmul.f32 %v3253_v2, %v3253_v2  ;;  %1686 = vmatpush.msra.mxu1 %v1558_v52  ;;  %1664 = vmatpush.msrb.mxu0 %v1553_v8 }
 0x544   :  { %1636 = vmatpush.msrb.mxu3 %v1572_v44  ;;  %1709 = vmatpush.msra.mxu2 %v1559_v7  ;;  %v2099_v7 = vld [vmem:[#allocation16 + $0xe8] sm:$0xff] }
 0x545   :  { %1508 = vadd.xlane.f32.xlu2 %v1505_v57  ;;  %1687 = vmatpush.msra.mxu1 %v1554_v9 }
 0x546   :  { %1637 = vmatpush.msrb.mxu3 %v1568_v1  ;;  %1710 = vmatpush.msra.mxu2 %v1555_v12 }
 0x548   :  { %1638 = vmatpush.msrb.mxu3 %v1564_v55  ;;  %v2117_v55 = vld [vmem:[#allocation16 + $0x178] sm:$0xff] }
 0x549   :  { %2184 = vmatpush.msrb.mxu1 %v2117_v55 }
 0x54a   :  { %1639 = vmatpush.msrb.mxu3 %v1560_v62 }
 0x54b   :  { %2185 = vmatpush.msrb.mxu1 %v2116_v63  ;;  %v2084_v63 = vld [vmem:[#allocation16 + $0x70] sm:$0xff] }
 0x54c   :  { %1640 = vmatpush.msrb.mxu3 %v1556_v45 }
 0x54e   :  { %1641 = vmatpush.msrb.mxu3 %v1552_v15 }
 0x5a0   :  { %v1507_v3 = vpop.xlane.xlu1 %1506 }
 0x5a1   :  { %v1510_v48 = vrot.slane %v1507_v3, 4 }
 0x5a3   :  { %v1511_v54 = vadd.f32 %v1510_v48, %v1507_v3  ;;  %v1619_v3 = vperm.slane %v3273_v47, 1 }
 0x5a5   :  { %v1512_v27 = vrot.slane %v1511_v54, 2 }
 0x5a7   :  { %v1513_v57 = vadd.f32 %v1512_v27, %v1511_v54  ;;  %v2101_v54 = vld [vmem:[#allocation16 + $0xf8] sm:$0xff] }
 0x5a8   :  { %2161 = vmatpush.msra.mxu0 %v2101_v54 }
 0x5a9   :  { %v1514_v11 = vrot.slane %v1513_v57, 1 }
 0x5aa   :  { %2162 = vmatpush.msra.mxu0 %v2100_v38 }
 0x5ab   :  { %v1515_v16 = vadd.f32 %v1514_v11, %v1513_v57  ;;  %v2115_v11 = vld [vmem:[#allocation16 + $0x168] sm:$0xff] }
 0x5ac   :  { %2163 = vmatpush.msra.mxu0 %v2099_v7  ;;  %2186 = vmatpush.msrb.mxu1 %v2115_v11  ;;  %v2113_v7 = vld [vmem:[#allocation16 + $0x158] sm:$0xff] }
 0x5ad   :  { %v1522_v17 = vmul.f32 %v1515_v16, %v3245_v51 }
 0x5af   :  { %v1524_v19 = vadd.f32 1e-05, %v1522_v17 }
 0x5b1   :  { %2521 = vrsqrt.f32 %v1524_v19  ;;  %vm1532_vm10 = vweird.f32 %v1524_v19 }
 0x5b7   :  { %v2522_v21 = vpop.eup %2521 }
 0x5b8   :  { %v1527_v20 = vmul.f32 %v2522_v21, %v1524_v19  ;;  %v1509_v22 = vpop.xlane.xlu2 %1508  ;;  %vm1533_vm9 = vweird.f32 %v2522_v21 }
 0x5b9   :  { %v1516_v56 = vrot.slane %v1509_v22, 4  ;;  %vm1534_vm11 = vmor %vm1532_vm10, %vm1533_vm9 }
 0x5ba   :  { %v1528_v23 = vmul.f32 %v2522_v21, %v1527_v20 }
 0x5bb   :  { %v1517_v24 = vadd.f32 %v1516_v56, %v1509_v22 }
 0x5bc   :  { %v1529_v25 = vmul.f32 0.5, %v1528_v23 }
 0x5bd   :  { %v1518_v26 = vrot.slane %v1517_v24, 2 }
 0x5be   :  { %v1530_v28 = vsub.f32 1.5, %v1529_v25 }
 0x5bf   :  { %v1519_v13 = vadd.f32 %v1518_v26, %v1517_v24  ;;  %v2098_v26 = vld [vmem:[#allocation16 + $0xe0] sm:$0xff] }
 0x5c0   :  { %v1531_v29 = vmul.f32 %v2522_v21, %v1530_v28  ;;  %v2114_v28 = vld [vmem:[#allocation16 + $0x160] sm:$0xff]  ;;  %2164 = vmatpush.msra.mxu0 %v2098_v26 }
 0x5c1   :  { %v1520_v30 = vrot.slane %v1519_v13, 1  ;;  %2187 = vmatpush.msrb.mxu1 %v2114_v28 }
 0x5c2   :  { %v1535_v4 = vsel %vm1534_vm11, %v2522_v21, %v1531_v29  ;;  %v2085_v21 = vld [vmem:[#allocation16 + $0x78] sm:$0xff] }
 0x5c3   :  { %v1521_v32 = vadd.f32 %v1520_v30, %v1519_v13  ;;  %v1546_v6 = vmul.f32 %v1535_v4, %v3248_v33  ;;  %2138 = vmatpush.msra.mxu3 %v2085_v21  ;;  %v2133_v13 = vld [vmem:[#allocation16 + $0x1f8] sm:$0xff]  ;;  %2188 = vmatpush.msrb.mxu1 %v2113_v7 }
 0x5c4   :  { %2207 = vmatpush.msrb.mxu2 %v2133_v13 }
 0x5c5   :  { %v1523_v14 = vmul.f32 %v1521_v32, %v3245_v51  ;;  %v1548_v10 = vmul.f32 %v1546_v6, %v1475_v31  ;;  %2139 = vmatpush.msra.mxu3 %v2084_v63 }
 0x5c7   :  { %v1525_v34 = vadd.f32 1e-05, %v1523_v14  ;;  %v3260_v35 = vadd.f32 %v1548_v10, %v1476_v60 }
 0x5c9   :  { %2523 = vrsqrt.f32 %v1525_v34  ;;  %1642 = vmatmul.f32.vlgmr.msrb.gmra.mxu3 %v3260_v35  ;;  %1665 = vmatmul.f32.vlgmr.msrb.gmra.mxu0 %v3260_v35  ;;  %vm1542_vm13 = vweird.f32 %v1525_v34 }
 0x5ca   :  { %1688 = vmatmul.f32.vlgmr.msra.gmra.mxu1 %v3260_v35  ;;  %1711 = vmatmul.f32.vlgmr.msra.gmra.mxu2 %v3260_v35 }
 0x5cf   :  { %v2524_v36 = vpop.eup %2523 }
 0x5d0   :  { %v1537_v37 = vmul.f32 %v2524_v36, %v1525_v34  ;;  %vm1543_vm12 = vweird.f32 %v2524_v36 }
 0x5d1   :  { %vm1544_vm14 = vmor %vm1542_vm13, %vm1543_vm12 }
 0x5d2   :  { %v1538_v39 = vmul.f32 %v2524_v36, %v1537_v37 }
 0x5d4   :  { %v1539_v33 = vmul.f32 0.5, %v1538_v39 }
 0x5d6   :  { %v1540_v40 = vsub.f32 1.5, %v1539_v33 }
 0x5d8   :  { %v1541_v41 = vmul.f32 %v2524_v36, %v1540_v40 }
 0x5da   :  { %v1545_v42 = vsel %vm1544_vm14, %v2524_v36, %v1541_v41 }
 0x5db   :  { %v1547_v43 = vmul.f32 %v1545_v42, %v3253_v2 }
 0x5dd   :  { %v1549_v44 = vmul.f32 %v1547_v43, %v1475_v31 }
 0x5df   :  { %v3267_v46 = vadd.f32 %v1549_v44, %v1476_v60 }
 0x5e1   :  { %1645 = vmatmul.f32.gmra.mxu3 %v3267_v46  ;;  %1668 = vmatmul.f32.gmra.mxu0 %v3267_v46 }
 0x5e2   :  { %1691 = vmatmul.f32.gmra.mxu1 %v3267_v46  ;;  %1714 = vmatmul.f32.gmra.mxu2 %v3267_v46 }
 0x646   :  { %v1666_v48 = vpop.f32.mrf.mxu0 }
 0x647   :  { %v3279_v2 = vadd.f32 %v1666_v48, %v1619_v3  ;;  %v1689_v1 = vpop.f32.mrf.mxu1 }
 0x648   :  { %v3283_v49 = vadd.f32 %v1689_v1, %v1620_v18 }
 0x649   :  { %v3286_v50 = vmul.f32 0.70710677, %v3279_v2  ;;  %v3361_v63 = vmul.f32 0.5, %v3279_v2  ;;  %v2092_v2 = vld [vmem:[#allocation16 + $0xb0] sm:$0xff] }
 0x64a   :  { %v3290_v58 = vmul.f32 0.70710677, %v3283_v49 }
 0x64b   :  { %v1774_v61 = vmul.f32 %v3286_v50, %v3286_v50 }
 0x64c   :  { %v1814_v27 = vmul.f32 %v3290_v58, %v3290_v58  ;;  %v1643_v62 = vpop.f32.mrf.mxu3 }
 0x64d   :  { %v3297_v0 = vmin.f32 %v1774_v61, 16.0  ;;  %v3301_v57 = vadd.f32 %v1643_v62, %v1618_v53  ;;  %v1712_v45 = vpop.f32.mrf.mxu2 }
 0x64e   :  { %v3303_v5 = vmin.f32 %v1814_v27, 16.0  ;;  %v3307_v52 = vadd.f32 %v1712_v45, %v1621_v59  ;;  %v2097_v45 = vld [vmem:[#allocation16 + $0xd8] sm:$0xff] }
 0x64f   :  { %v1776_v15 = vmul.f32 2.1237322e-06, %v3297_v0  ;;  %v1787_v8 = vmul.f32 3.8918573e-05, %v3297_v0  ;;  %v3314_v16 = vmul.f32 0.70710677, %v3301_v57  ;;  %2165 = vmatpush.msra.mxu0 %v2097_v45 }
 0x650   :  { %v1816_v9 = vmul.f32 2.1237322e-06, %v3303_v5  ;;  %v1827_v12 = vmul.f32 3.8918573e-05, %v3303_v5  ;;  %v3319_v23 = vmul.f32 0.70710677, %v3307_v52 }
 0x651   :  { %v1777_v17 = vadd.f32 0.00028619796, %v1776_v15  ;;  %v1788_v19 = vadd.f32 0.001143296, %v1787_v8  ;;  %v1734_v56 = vmul.f32 %v3314_v16, %v3314_v16 }
 0x652   :  { %v1817_v20 = vadd.f32 0.00028619796, %v1816_v9  ;;  %v1828_v22 = vadd.f32 0.001143296, %v1827_v12  ;;  %v1854_v31 = vmul.f32 %v3319_v23, %v3319_v23  ;;  %v2132_v12 = vld [vmem:[#allocation16 + $0x1f0] sm:$0xff] }
 0x653   :  { %v1778_v24 = vmul.f32 %v1777_v17, %v3297_v0  ;;  %v1789_v25 = vmul.f32 %v1788_v19, %v3297_v0  ;;  %v3325_v4 = vmin.f32 %v1734_v56, 16.0  ;;  %2208 = vmatpush.msrb.mxu2 %v2132_v12 }
 0x654   :  { %v1818_v29 = vmul.f32 %v1817_v20, %v3303_v5  ;;  %v1829_v30 = vmul.f32 %v1828_v22, %v3303_v5  ;;  %v3333_v39 = vmin.f32 %v1854_v31, 16.0  ;;  %v2131_v31 = vld [vmem:[#allocation16 + $0x1e8] sm:$0xff] }
 0x655   :  { %v1779_v32 = vadd.f32 0.0036580483, %v1778_v24  ;;  %v1790_v6 = vadd.f32 0.014752088, %v1789_v25  ;;  %v1736_v10 = vmul.f32 2.1237322e-06, %v3325_v4  ;;  %2209 = vmatpush.msrb.mxu2 %v2131_v31 }
 0x656   :  { %v1819_v60 = vadd.f32 0.0036580483, %v1818_v29  ;;  %v1830_v14 = vadd.f32 0.014752088, %v1829_v30  ;;  %v1747_v37 = vmul.f32 3.8918573e-05, %v3325_v4 }
 0x657   :  { %v1780_v34 = vmul.f32 %v1779_v32, %v3297_v0  ;;  %v1791_v36 = vmul.f32 %v1790_v6, %v3297_v0  ;;  %v1737_v41 = vadd.f32 0.00028619796, %v1736_v10  ;;  %v1856_v55 = vmul.f32 2.1237322e-06, %v3333_v39  ;;  %v2083_v24 = vld [vmem:[#allocation16 + $0x68] sm:$0xff]  ;;  %v2096_v25 = vld [vmem:[#allocation16 + $0xd0] sm:$0xff] }
 0x658   :  { %v1820_v33 = vmul.f32 %v1819_v60, %v3303_v5  ;;  %v1831_v40 = vmul.f32 %v1830_v14, %v3303_v5  ;;  %v1748_v44 = vadd.f32 0.001143296, %v1747_v37  ;;  %v1867_v38 = vmul.f32 3.8918573e-05, %v3333_v39  ;;  %2140 = vmatpush.msra.mxu3 %v2083_v24  ;;  %2166 = vmatpush.msra.mxu0 %v2096_v25  ;;  %v2112_v30 = vld [vmem:[#allocation16 + $0x150] sm:$0xff]  ;;  %v2082_v32 = vld [vmem:[#allocation16 + $0x60] sm:$0xff] }
 0x659   :  { %v1781_v42 = vadd.f32 0.05243302, %v1780_v34  ;;  %v1792_v43 = vadd.f32 0.112945676, %v1791_v36  ;;  %v1738_v54 = vmul.f32 %v1737_v41, %v3325_v4  ;;  %v1857_v9 = vadd.f32 0.00028619796, %v1856_v55  ;;  %2189 = vmatpush.msrb.mxu1 %v2112_v30 }
 0x65a   :  { %v1821_v48 = vadd.f32 0.05243302, %v1820_v33  ;;  %v1832_v1 = vadd.f32 0.112945676, %v1831_v40  ;;  %v1749_v62 = vmul.f32 %v1748_v44, %v3325_v4  ;;  %v1868_v29 = vadd.f32 0.001143296, %v1867_v38  ;;  %2141 = vmatpush.msra.mxu3 %v2082_v32 }
 0x65b   :  { %v1782_v61 = vmul.f32 %v1781_v42, %v3297_v0  ;;  %v1793_v27 = vmul.f32 %v1792_v43, %v3297_v0  ;;  %v1739_v8 = vadd.f32 0.0036580483, %v1738_v54  ;;  %v1858_v56 = vmul.f32 %v1857_v9, %v3333_v39  ;;  %v2095_v10 = vld [vmem:[#allocation16 + $0xc8] sm:$0xff]  ;;  %v2130_v37 = vld [vmem:[#allocation16 + $0x1e0] sm:$0xff]  ;;  %v2129_v54 = vld [vmem:[#allocation16 + $0x1d8] sm:$0xff] }
 0x65c   :  { %v1822_v11 = vmul.f32 %v1821_v48, %v3303_v5  ;;  %v1833_v15 = vmul.f32 %v1832_v1, %v3303_v5  ;;  %v1750_v21 = vadd.f32 0.014752088, %v1749_v62  ;;  %v2111_v34 = vld [vmem:[#allocation16 + $0x148] sm:$0xff]  ;;  %2167 = vmatpush.msra.mxu0 %v2095_v10  ;;  %v1869_v42 = vmul.f32 %v1868_v29, %v3333_v39  ;;  %2210 = vmatpush.msrb.mxu2 %v2130_v37  ;;  %v2094_v43 = vld [vmem:[#allocation16 + $0xc0] sm:$0xff]  ;;  %v2080_v55 = vld [vmem:[#allocation16 + $0x50] sm:$0xff] }
 0x65d   :  { %v1783_v17 = vadd.f32 0.18741608, %v1782_v61  ;;  %v1794_v19 = vadd.f32 0.4994258, %v1793_v27  ;;  %v1740_v28 = vmul.f32 %v1739_v8, %v3325_v4  ;;  %v1859_v14 = vadd.f32 0.0036580483, %v1858_v56  ;;  %2190 = vmatpush.msrb.mxu1 %v2111_v34 }
 0x65e   :  { %v1823_v20 = vadd.f32 0.18741608, %v1822_v11  ;;  %v1834_v22 = vadd.f32 0.4994258, %v1833_v15  ;;  %v1751_v13 = vmul.f32 %v1750_v21, %v3325_v4  ;;  %v2110_v44 = vld [vmem:[#allocation16 + $0x140] sm:$0xff]  ;;  %2168 = vmatpush.msra.mxu0 %v2094_v43  ;;  %v1669_v27 = vpop.f32.mrf.mxu0  ;;  %2211 = vmatpush.msrb.mxu2 %v2129_v54  ;;  %v2109_v62 = vld [vmem:[#allocation16 + $0x138] sm:$0xff] }
 0x65f   :  { %v1795_v26 = vmul.f32 %v1794_v19, %v3297_v0  ;;  %v1784_v6 = vmul.f32 %v1783_v17, %v3297_v0  ;;  %v2081_v0 = vld [vmem:[#allocation16 + $0x58] sm:$0xff]  ;;  %v1741_v48 = vadd.f32 0.05243302, %v1740_v28  ;;  %v1860_v1 = vmul.f32 %v1859_v14, %v3333_v39  ;;  %2191 = vmatpush.msrb.mxu1 %v2110_v44  ;;  %v2128_v38 = vld [vmem:[#allocation16 + $0x1d0] sm:$0xff]  ;;  %v1692_v15 = vpop.f32.mrf.mxu1  ;;  %v2079_v8 = vld [vmem:[#allocation16 + $0x48] sm:$0xff] }
 0x660   :  { %v1835_v60 = vmul.f32 %v1834_v22, %v3303_v5  ;;  %v1824_v33 = vmul.f32 %v1823_v20, %v3303_v5  ;;  %v1752_v41 = vadd.f32 0.112945676, %v1751_v13  ;;  %2142 = vmatpush.msra.mxu3 %v2081_v0  ;;  %v2093_v5 = vld [vmem:[#allocation16 + $0xb8] sm:$0xff]  ;;  %v1870_v11 = vadd.f32 0.014752088, %v1869_v42  ;;  %2212 = vmatpush.msrb.mxu2 %v2128_v38  ;;  %v2108_v21 = vld [vmem:[#allocation16 + $0x130] sm:$0xff] }
 0x661   :  { %v3351_v36 = vadd.f32 1.0, %v1795_v26  ;;  %v1785_v61 = vadd.f32 1.1283791, %v1784_v6  ;;  %2169 = vmatpush.msra.mxu0 %v2093_v5  ;;  %2192 = vmatpush.msrb.mxu1 %v2109_v62  ;;  %v3365_v9 = vmul.f32 0.5, %v3283_v49  ;;  %v1742_v12 = vmul.f32 %v1741_v48, %v3325_v4  ;;  %v2127_v20 = vld [vmem:[#allocation16 + $0x1c8] sm:$0xff]  ;;  %v2078_v24 = vld [vmem:[#allocation16 + $0x40] sm:$0xff] }
 0x662   :  { %v3354_v40 = vadd.f32 1.0, %v1835_v60  ;;  %2143 = vmatpush.msra.mxu3 %v2080_v55  ;;  %v1825_v45 = vadd.f32 1.1283791, %v1824_v33  ;;  %v1753_v7 = vmul.f32 %v1752_v41, %v3325_v4  ;;  %v1861_v17 = vadd.f32 0.05243302, %v1860_v1  ;;  %v2091_v25 = vld [vmem:[#allocation16 + $0xa8] sm:$0xff]  ;;  %2213 = vmatpush.msrb.mxu2 %v2127_v20 }
 0x663   :  { %2525 = vrcp.f32 %v3351_v36  ;;  %v3370_v19 = vadd.f32 %v1669_v27, %v1619_v3  ;;  %v3373_v22 = vmul.f32 %v1785_v61, %v3286_v50  ;;  %vm1802_vm15 = vweird.f32 %v3351_v36  ;;  %2170 = vmatpush.msra.mxu0 %v2092_v2  ;;  %2193 = vmatpush.msrb.mxu1 %v2108_v21  ;;  %v2107_v26 = vld [vmem:[#allocation16 + $0x128] sm:$0xff]  ;;  %v2126_v30 = vld [vmem:[#allocation16 + $0x1c0] sm:$0xff]  ;;  %v2077_v10 = vld [vmem:[#allocation16 + $0x38] sm:$0xff] }
 0x664   :  { %2527 = vrcp.f32 %v3354_v40  ;;  %2144 = vmatpush.msra.mxu3 %v2079_v8  ;;  %v1754_v56 = vadd.f32 0.4994258, %v1753_v7  ;;  %v1871_v49 = vmul.f32 %v1870_v11, %v3333_v39  ;;  %v1806_v3 = vand.u32 2147483647, %v3351_v36  ;;  %v2106_v34 = vld [vmem:[#allocation16 + $0x120] sm:$0xff]  ;;  %2214 = vmatpush.msrb.mxu2 %v2126_v30  ;;  %v2076_v0 = vld [vmem:[#allocation16 + $0x30] sm:$0xff]  ;;  %v1646_v20 = vpop.f32.mrf.mxu3 }
 0x665   :  { %v1808_v13 = vand.u32 2147483648, %v3351_v36  ;;  %v3382_v29 = vmul.f32 0.70710677, %v3370_v19  ;;  %v3386_v50 = vadd.f32 %v1692_v15, %v1620_v18  ;;  %v3393_v6 = vmul.f32 %v1825_v45, %v3290_v58  ;;  %2171 = vmatpush.msra.mxu0 %v2091_v25  ;;  %2194 = vmatpush.msrb.mxu1 %v2107_v26  ;;  %v2090_v18 = vld [vmem:[#allocation16 + $0xa0] sm:$0xff]  ;;  %v2125_v58 = vld [vmem:[#allocation16 + $0x1b8] sm:$0xff]  ;;  %v2124_v27 = vld [vmem:[#allocation16 + $0x1b0] sm:$0xff] }
 0x666   :  { %2145 = vmatpush.msra.mxu3 %v2078_v24  ;;  %v1846_v60 = vand.u32 2147483647, %v3354_v40  ;;  %v1755_v14 = vmul.f32 %v1754_v56, %v3325_v4  ;;  %v1743_v33 = vadd.f32 0.18741608, %v1742_v12  ;;  %v1862_v41 = vmul.f32 %v1861_v17, %v3333_v39  ;;  %v2089_v1 = vld [vmem:[#allocation16 + $0x98] sm:$0xff]  ;;  %2215 = vmatpush.msrb.mxu2 %v2125_v58  ;;  %v2075_v62 = vld [vmem:[#allocation16 + $0x28] sm:$0xff] }
 0x667   :  { %v1872_v42 = vadd.f32 0.112945676, %v1871_v49  ;;  %v1934_v48 = vmul.f32 %v3382_v29, %v3382_v29  ;;  %2172 = vmatpush.msra.mxu0 %v2090_v18  ;;  %2195 = vmatpush.msrb.mxu1 %v2106_v34  ;;  %v2105_v54 = vld [vmem:[#allocation16 + $0x118] sm:$0xff]  ;;  %vm1842_vm1 = vweird.f32 %v3354_v40  ;;  %v3408_v61 = vmul.f32 0.70710677, %v3386_v50  ;;  %v2088_v11 = vld [vmem:[#allocation16 + $0x90] sm:$0xff] }
 0x668   :  { %2146 = vmatpush.msra.mxu3 %v2077_v10  ;;  %v3401_v44 = vadd.f32 1.0, %v1755_v14  ;;  %vm3411_vm2 = vcmp.eq.f32.partialorder %v1806_v3, 8.507059e+37  ;;  %v1848_v7 = vand.u32 2147483648, %v3354_v40  ;;  %v2104_v15 = vld [vmem:[#allocation16 + $0x110] sm:$0xff]  ;;  %v2123_v8 = vld [vmem:[#allocation16 + $0x1a8] sm:$0xff]  ;;  %v1744_v2 = vmul.f32 %v1743_v33, %v3325_v4  ;;  %2216 = vmatpush.msrb.mxu2 %v2124_v27  ;;  %v2074_v56 = vld [vmem:[#allocation16 + $0x20] sm:$0xff] }
 0x669   :  { %v3377_v28 = vpop.eup %2525  ;;  %v1873_v5 = vmul.f32 %v1872_v42, %v3333_v39  ;;  %2173 = vmatpush.msra.mxu0 %v2089_v1  ;;  %2196 = vmatpush.msrb.mxu1 %v2105_v54  ;;  %v1863_v24 = vadd.f32 0.18741608, %v1862_v41  ;;  %v3429_v25 = vmin.f32 %v1934_v48, 16.0  ;;  %v1974_v26 = vmul.f32 %v3408_v61, %v3408_v61  ;;  %v2087_v3 = vld [vmem:[#allocation16 + $0x88] sm:$0xff]  ;;  %v2073_v34 = vld [vmem:[#allocation16 + $0x18] sm:$0xff]  ;;  %v2102_v33 = vld [vmem:[#allocation16 + $0x100] sm:$0xff] }
 0x66a   :  { %v3388_v31 = vpop.eup %2527  ;;  %v1798_v32 = vmul.f32 %v3377_v28, %v3351_v36  ;;  %vm1803_vm0 = vweird.f32 %v3377_v28  ;;  %2147 = vmatpush.msra.mxu3 %v2076_v0  ;;  %2529 = vrcp.f32 %v3401_v44  ;;  %v2103_v30 = vld [vmem:[#allocation16 + $0x108] sm:$0xff]  ;;  %v1809_v4 = vor.u32 1.1754944e-38, %v1808_v13  ;;  %2217 = vmatpush.msrb.mxu2 %v2123_v8  ;;  %v2121_v58 = vld [vmem:[#allocation16 + $0x198] sm:$0xff]  ;;  %v2072_v48 = vld [vmem:[#allocation16 + $0x10] sm:$0xff] }
 0x66b   :  { %v1838_v37 = vmul.f32 %v3388_v31, %v3354_v40  ;;  %vm3421_vm3 = vmor %vm1802_vm15, %vm1803_vm0  ;;  %vm1843_vm4 = vweird.f32 %v3388_v31  ;;  %v1874_v21 = vadd.f32 0.4994258, %v1873_v5  ;;  %2174 = vmatpush.msra.mxu0 %v2088_v11  ;;  %2197 = vmatpush.msrb.mxu1 %v2104_v15  ;;  %vm3436_vm5 = vcmp.eq.f32.partialorder %v1846_v60, 8.507059e+37  ;;  %v2120_v27 = vld [vmem:[#allocation16 + $0x190] sm:$0xff] }
 0x66c   :  { %v1799_v43 = vsub.f32 1.0, %v1798_v32  ;;  %2148 = vmatpush.msra.mxu3 %v2075_v62  ;;  %v2122_v32 = vld [vmem:[#allocation16 + $0x1a0] sm:$0xff]  ;;  %vm3448_vm6 = vmor %vm1842_vm1, %vm1843_vm4  ;;  %v1849_v13 = vor.u32 1.1754944e-38, %v1848_v7  ;;  %v1936_v60 = vmul.f32 2.1237322e-06, %v3429_v25  ;;  %v3455_v42 = vadd.f32 %v1646_v20, %v1618_v53 }
 0x66d   :  { %v1839_v55 = vsub.f32 1.0, %v1838_v37  ;;  %v1875_v18 = vmul.f32 %v1874_v21, %v3333_v39  ;;  %v2086_v37 = vld [vmem:[#allocation16 + $0x80] sm:$0xff]  ;;  %2175 = vmatpush.msra.mxu0 %v2087_v3  ;;  %2198 = vmatpush.msrb.mxu1 %v2103_v30  ;;  %v1864_v5 = vmul.f32 %v1863_v24, %v3333_v39  ;;  %v2119_v39 = vld [vmem:[#allocation16 + $0x188] sm:$0xff]  ;;  %v3478_v8 = vmul.f32 0.5, %v3301_v57 }
 0x66e   :  { %v1800_v38 = vmul.f32 %v3377_v28, %v1799_v43  ;;  %2149 = vmatpush.msra.mxu3 %v2074_v56  ;;  %v3464_v43 = vmin.f32 %v1974_v26, 16.0  ;;  %2218 = vmatpush.msrb.mxu2 %v2122_v32  ;;  %v1937_v7 = vadd.f32 0.00028619796, %v1936_v60  ;;  %v3475_v11 = vmul.f32 0.70710677, %v3455_v42  ;;  %v2118_v24 = vld [vmem:[#allocation16 + $0x180] sm:$0xff] }
 0x66f   :  { %v1840_v17 = vmul.f32 %v3388_v31, %v1839_v55  ;;  %v3462_v0 = vadd.f32 1.0, %v1875_v18  ;;  %v1745_v55 = vadd.f32 1.1283791, %v1744_v2  ;;  %2176 = vmatpush.msra.mxu0 %v2086_v37  ;;  %2199 = vmatpush.msrb.mxu1 %v2102_v33  ;;  %v2070_v2 = vld [vmem:[#allocation16] sm:$0xff]  ;;  %v1768_v56 = vand.u32 2147483648, %v3401_v44 }
 0x670   :  { %v1801_v49 = vadd.f32 %v3377_v28, %v1800_v38  ;;  %2150 = vmatpush.msra.mxu3 %v2073_v34  ;;  %v2530_v1 = vpop.eup %2529  ;;  %v1766_v38 = vand.u32 2147483647, %v3401_v44  ;;  %2219 = vmatpush.msrb.mxu2 %v2121_v58  ;;  %v1976_v12 = vmul.f32 2.1237322e-06, %v3464_v43  ;;  %vm1762_vm7 = vweird.f32 %v3401_v44 }
 0x671   :  { %v1841_v14 = vadd.f32 %v3388_v31, %v1840_v17  ;;  %v1758_v62 = vmul.f32 %v2530_v1, %v3401_v44  ;;  %2531 = vrcp.f32 %v3462_v0  ;;  %v1715_v17 = vpop.f32.mrf.mxu2  ;;  %v1746_v20 = vmul.f32 %v1745_v55, %v3314_v16 }
 0x672   :  { %v1805_v41 = vsel %vm3421_vm3, %v3377_v28, %v1801_v49  ;;  %2151 = vmatpush.msra.mxu3 %v2072_v48  ;;  %2220 = vmatpush.msrb.mxu2 %v2120_v27  ;;  %v1865_v49 = vadd.f32 1.1283791, %v1864_v5  ;;  %vm1763_vm8 = vweird.f32 %v2530_v1  ;;  %v1894_v30 = vmul.f32 %v3475_v11, %v3475_v11 }
 0x673   :  { %v1810_v28 = vsel %vm3411_vm2, %v1809_v4, %v1805_v41  ;;  %v1845_v40 = vsel %vm3448_vm6, %v3388_v31, %v1841_v14  ;;  %v3489_v32 = vadd.f32 %v1715_v17, %v1621_v59  ;;  %v1947_v16 = vmul.f32 3.8918573e-05, %v3429_v25  ;;  %vm1764_vm9 = vmor %vm1762_vm7, %vm1763_vm8 }
 0x674   :  { %v1811_v53 = vmul.f32 %v1810_v28, %v3373_v22  ;;  %v1850_v54 = vsel %vm3436_vm5, %v1849_v13, %v1845_v40  ;;  %v2071_v22 = vld [vmem:[#allocation16 + $0x8] sm:$0xff]  ;;  %2221 = vmatpush.msrb.mxu2 %v2119_v39  ;;  %v1938_v44 = vmul.f32 %v1937_v7, %v3429_v25  ;;  %v1977_v18 = vadd.f32 0.00028619796, %v1976_v12 }
 0x675   :  { %v1851_v31 = vmul.f32 %v1850_v54, %v3393_v6  ;;  %v1759_v6 = vsub.f32 1.0, %v1758_v62  ;;  %2152 = vmatpush.msra.mxu3 %v2071_v22  ;;  %vm1767_vm10 = vcmp.eq.f32.partialorder %v1766_v38, 8.507059e+37  ;;  %v1866_v34 = vmul.f32 %v1865_v49, %v3319_v23 }
 0x676   :  { %v2377_v45 = vclamps-f32 %v1811_v53, 1.0  ;;  %2222 = vmatpush.msrb.mxu2 %v2118_v24  ;;  %v1886_v59 = vand.u32 2147483647, %v3462_v0  ;;  %v1888_v33 = vand.u32 2147483648, %v3462_v0  ;;  %v3501_v13 = vmin.f32 %v1894_v30, 16.0 }
 0x677   :  { %v2378_v15 = vclamps-f32 %v1851_v31, 1.0  ;;  %v1760_v3 = vmul.f32 %v2530_v1, %v1759_v6  ;;  %2153 = vmatpush.msra.mxu3 %v2070_v2  ;;  %v2532_v4 = vpop.eup %2531  ;;  %v1948_v60 = vadd.f32 0.001143296, %v1947_v16  ;;  %v1939_v28 = vadd.f32 0.0036580483, %v1938_v44 }
 0x678   :  { %v2055_v21 = vadd.f32 1.0, %v2377_v45  ;;  %v1878_v37 = vmul.f32 %v2532_v4, %v3462_v0  ;;  %v1978_v23 = vmul.f32 %v1977_v18, %v3464_v43  ;;  %vm1883_vm11 = vweird.f32 %v2532_v4 }
 0x679   :  { %v2056_v26 = vadd.f32 1.0, %v2378_v15  ;;  %v1761_v10 = vadd.f32 %v2530_v1, %v1760_v3  ;;  %v1987_v53 = vmul.f32 3.8918573e-05, %v3464_v43  ;;  %vm1882_vm12 = vweird.f32 %v3462_v0 }
 0x67a   :  { %v2063_v57 = vmul.f32 %v2055_v21, %v3361_v63  ;;  %v1769_v63 = vor.u32 1.1754944e-38, %v1768_v56  ;;  %v1879_v36 = vsub.f32 1.0, %v1878_v37  ;;  %vm3509_vm13 = vcmp.eq.f32.partialorder %v1886_v59, 8.507059e+37  ;;  %vm1884_vm14 = vmor %vm1882_vm12, %vm1883_vm11 }
 0x67b   :  { %v2064_v14 = vmul.f32 %v2056_v26, %v3365_v9  ;;  %v1765_v47 = vsel %vm1764_vm9, %v2530_v1, %v1761_v10  ;;  %v3499_v9 = vmul.f32 0.70710677, %v3489_v32  ;;  %v1949_v1 = vmul.f32 %v1948_v60, %v3429_v25 }
 0x67c   :  { %2177 = vmatmul.f32.vlgmr.msra.gmra.mxu0 %v2063_v57  ;;  %v1770_v41 = vsel %vm1767_vm10, %v1769_v63, %v1765_v47  ;;  %v1880_v48 = vmul.f32 %v2532_v4, %v1879_v36  ;;  %v1896_v31 = vmul.f32 2.1237322e-06, %v3501_v13  ;;  %v1988_v38 = vadd.f32 0.001143296, %v1987_v53 }
 0x67d   :  { %2200 = vmatmul.f32.vlgmr.msrb.gmra.mxu1 %v2064_v14  ;;  %v1771_v58 = vmul.f32 %v1770_v41, %v1746_v20  ;;  %v2014_v40 = vmul.f32 %v3499_v9, %v3499_v9  ;;  %v1950_v62 = vadd.f32 0.014752088, %v1949_v1  ;;  %v1889_v45 = vor.u32 1.1754944e-38, %v1888_v33 }
 0x67e   :  { %v1881_v27 = vadd.f32 %v2532_v4, %v1880_v48  ;;  %v1940_v7 = vmul.f32 %v1939_v28, %v3429_v25  ;;  %v1979_v0 = vadd.f32 0.0036580483, %v1978_v23  ;;  %v1989_v12 = vmul.f32 %v1988_v38, %v3464_v43 }
 0x67f   :  { %v2376_v54 = vclamps-f32 %v1771_v58, 1.0  ;;  %v3513_v5 = vmin.f32 %v2014_v40, 16.0  ;;  %v1951_v6 = vmul.f32 %v1950_v62, %v3429_v25  ;;  %v1897_v20 = vadd.f32 0.00028619796, %v1896_v31 }
 0x680   :  { %v1885_v15 = vsel %vm1884_vm14, %v2532_v4, %v1881_v27  ;;  %v1990_v24 = vadd.f32 0.014752088, %v1989_v12  ;;  %v1907_v26 = vmul.f32 3.8918573e-05, %v3501_v13  ;;  %v1941_v57 = vadd.f32 0.05243302, %v1940_v7 }
 0x681   :  { %v2054_v22 = vadd.f32 1.0, %v2376_v54  ;;  %v2016_v39 = vmul.f32 2.1237322e-06, %v3513_v5  ;;  %v1890_v2 = vsel %vm3509_vm13, %v1889_v45, %v1885_v15  ;;  %v1952_v49 = vadd.f32 0.112945676, %v1951_v6 }
 0x682   :  { %v1891_v21 = vmul.f32 %v1890_v2, %v1866_v34  ;;  %v1980_v30 = vmul.f32 %v1979_v0, %v3464_v43  ;;  %v1991_v4 = vmul.f32 %v1990_v24, %v3464_v43  ;;  %v2027_v14 = vmul.f32 3.8918573e-05, %v3513_v5 }
 0x683   :  { %v2062_v17 = vmul.f32 %v2054_v22, %v3478_v8  ;;  %v2017_v56 = vadd.f32 0.00028619796, %v2016_v39  ;;  %v1953_v16 = vmul.f32 %v1952_v49, %v3429_v25  ;;  %v1908_v8 = vadd.f32 0.001143296, %v1907_v26 }
 0x684   :  { %v2379_v3 = vclamps-f32 %v1891_v21, 1.0  ;;  %v1721_v10 = vmul.f32 0.5, %v3307_v52  ;;  %v1898_v18 = vmul.f32 %v1897_v20, %v3501_v13  ;;  %v1992_v37 = vadd.f32 0.112945676, %v1991_v4 }
 0x685   :  { %2154 = vmatmul.f32.vlgmr.msra.gmra.mxu3 %v2062_v17  ;;  %v2018_v63 = vmul.f32 %v2017_v56, %v3513_v5  ;;  %v1954_v34 = vadd.f32 0.4994258, %v1953_v16  ;;  %v1909_v47 = vmul.f32 %v1908_v8, %v3501_v13  ;;  %v2028_v59 = vadd.f32 0.001143296, %v2027_v14 }
 0x686   :  { %v2057_v44 = vadd.f32 1.0, %v2379_v3  ;;  %v1942_v41 = vmul.f32 %v1941_v57, %v3429_v25  ;;  %v1981_v36 = vadd.f32 0.05243302, %v1980_v30  ;;  %v1993_v58 = vmul.f32 %v1992_v37, %v3464_v43 }
 0x687   :  { %v1955_v60 = vmul.f32 %v1954_v34, %v3429_v25  ;;  %v1910_v28 = vadd.f32 0.014752088, %v1909_v47  ;;  %v2029_v52 = vmul.f32 %v2028_v59, %v3513_v5  ;;  %v1899_v23 = vadd.f32 0.0036580483, %v1898_v18 }
 0x688   :  { %v2065_v33 = vmul.f32 %v2057_v44, %v1721_v10  ;;  %v2019_v40 = vadd.f32 0.0036580483, %v2018_v63  ;;  %v1994_v1 = vadd.f32 0.4994258, %v1993_v58  ;;  %v1943_v55 = vadd.f32 0.18741608, %v1942_v41 }
 0x689   :  { %v1956_v48 = vadd.f32 1.0, %v1955_v60  ;;  %v1911_v53 = vmul.f32 %v1910_v28, %v3501_v13  ;;  %v2030_v54 = vadd.f32 0.014752088, %v2029_v52  ;;  %v1982_v27 = vmul.f32 %v1981_v36, %v3464_v43 }
 0x68a   :  { %2223 = vmatmul.f32.vlgmr.msrb.gmra.mxu2 %v2065_v33  ;;  %v1900_v31 = vmul.f32 %v1899_v23, %v3501_v13  ;;  %v1995_v62 = vmul.f32 %v1994_v1, %v3464_v43  ;;  %v2020_v45 = vmul.f32 %v2019_v40, %v3513_v5  ;;  %v1944_v0 = vmul.f32 %v1943_v55, %v3429_v25 }
 0x68b   :  { %2533 = vrcp.f32 %v1956_v48  ;;  %v1912_v38 = vadd.f32 0.112945676, %v1911_v53  ;;  %v2031_v22 = vmul.f32 %v2030_v54, %v3513_v5  ;;  %v1983_v6 = vadd.f32 0.18741608, %v1982_v27 }
 0x68c   :  { %v1996_v7 = vadd.f32 1.0, %v1995_v62  ;;  %v1901_v12 = vadd.f32 0.05243302, %v1900_v31  ;;  %v2021_v2 = vadd.f32 0.05243302, %v2020_v45  ;;  %v1968_v16 = vand.u32 2147483648, %v1956_v48 }
 0x68d   :  { %v1913_v39 = vmul.f32 %v1912_v38, %v3501_v13  ;;  %v2032_v15 = vadd.f32 0.112945676, %v2031_v22  ;;  %v1945_v49 = vadd.f32 1.1283791, %v1944_v0  ;;  %v1984_v3 = vmul.f32 %v1983_v6, %v3464_v43 }
 0x68e   :  { %2535 = vrcp.f32 %v1996_v7  ;;  %v1902_v57 = vmul.f32 %v1901_v12, %v3501_v13  ;;  %v2022_v25 = vmul.f32 %v2021_v2, %v3513_v5  ;;  %v1966_v44 = vand.u32 2147483647, %v1956_v48 }
 0x68f   :  { %v1914_v21 = vadd.f32 0.4994258, %v1913_v39  ;;  %v2033_v20 = vmul.f32 %v2032_v15, %v3513_v5  ;;  %v1946_v18 = vmul.f32 %v1945_v49, %v3382_v29  ;;  %v1985_v43 = vadd.f32 1.1283791, %v1984_v3 }
 0x690   :  { %vm1962_vm0 = vweird.f32 %v1956_v48  ;;  %v1903_v47 = vadd.f32 0.18741608, %v1902_v57  ;;  %v2023_v59 = vadd.f32 0.18741608, %v2022_v25  ;;  %v1969_v33 = vor.u32 1.1754944e-38, %v1968_v16 }
 0x691   :  { %v2534_v17 = vpop.eup %2533  ;;  %v1915_v24 = vmul.f32 %v1914_v21, %v3501_v13  ;;  %v2034_v26 = vadd.f32 0.4994258, %v2033_v20  ;;  %vm1967_vm2 = vcmp.eq.f32.partialorder %v1966_v44, 8.507059e+37  ;;  %v2008_v60 = vand.u32 2147483648, %v1996_v7 }
 0x692   :  { %v1958_v56 = vmul.f32 %v2534_v17, %v1956_v48  ;;  %vm1963_vm15 = vweird.f32 %v2534_v17  ;;  %v2006_v28 = vand.u32 2147483647, %v1996_v7  ;;  %v1904_v40 = vmul.f32 %v1903_v47, %v3501_v13 }
 0x693   :  { %v3549_v4 = vadd.f32 1.0, %v1915_v24  ;;  %v2035_v8 = vmul.f32 %v2034_v26, %v3513_v5  ;;  %vm1964_vm1 = vmor %vm1962_vm0, %vm1963_vm15  ;;  %vm2002_vm4 = vweird.f32 %v1996_v7  ;;  %v1723_v1 = vmul.f32 0.5, %v3370_v19 }
 0x694   :  { %v1959_v30 = vsub.f32 1.0, %v1958_v56  ;;  %v2536_v14 = vpop.eup %2535  ;;  %v2009_v54 = vor.u32 1.1754944e-38, %v2008_v60  ;;  %v1986_v27 = vmul.f32 %v1985_v43, %v3408_v61  ;;  %v2024_v31 = vmul.f32 %v2023_v59, %v3513_v5 }
 0x695   :  { %v1998_v63 = vmul.f32 %v2536_v14, %v1996_v7  ;;  %2537 = vrcp.f32 %v3549_v4  ;;  %v3554_v37 = vadd.f32 1.0, %v2035_v8  ;;  %vm2003_vm3 = vweird.f32 %v2536_v14 }
 0x696   :  { %v1960_v10 = vmul.f32 %v2534_v17, %v1959_v30  ;;  %vm2004_vm5 = vmor %vm2002_vm4, %vm2003_vm3  ;;  %vm2007_vm6 = vcmp.eq.f32.partialorder %v2006_v28, 8.507059e+37  ;;  %v1928_v13 = vand.u32 2147483648, %v3549_v4  ;;  %v1905_v7 = vadd.f32 1.1283791, %v1904_v40 }
 0x697   :  { %v1999_v41 = vsub.f32 1.0, %v1998_v63  ;;  %2539 = vrcp.f32 %v3554_v37  ;;  %v1926_v12 = vand.u32 2147483647, %v3549_v4  ;;  %v1724_v61 = vmul.f32 0.5, %v3386_v50 }
 0x698   :  { %v1961_v34 = vadd.f32 %v2534_v17, %v1960_v10  ;;  %v2025_v5 = vadd.f32 1.1283791, %v2024_v31  ;;  %vm1922_vm8 = vweird.f32 %v3549_v4  ;;  %v1929_v20 = vor.u32 1.1754944e-38, %v1928_v13 }
 0x699   :  { %v2000_v29 = vmul.f32 %v2536_v14, %v1999_v41  ;;  %v2048_v56 = vand.u32 2147483648, %v3554_v37  ;;  %v2046_v26 = vand.u32 2147483647, %v3554_v37  ;;  %v1906_v3 = vmul.f32 %v1905_v7, %v3475_v11 }
 0x69a   :  { %v1965_v36 = vsel %vm1964_vm1, %v2534_v17, %v1961_v34  ;;  %vm1927_vm11 = vcmp.eq.f32.partialorder %v1926_v12, 8.507059e+37  ;;  %vm2042_vm12 = vweird.f32 %v3554_v37  ;;  %v2026_v8 = vmul.f32 %v2025_v5, %v3499_v9  ;;  %v2454_v9 = vld [vmem:[%s3602_s10] ss:$0 sm:$0xff] }
 0x69b   :  { %v1970_v58 = vsel %vm1967_vm2, %v1969_v33, %v1965_v36  ;;  %v2538_v23 = vpop.eup %2537  ;;  %v2001_v48 = vadd.f32 %v2536_v14, %v2000_v29  ;;  %vm2047_vm14 = vcmp.eq.f32.partialorder %v2046_v26, 8.507059e+37  ;;  %v1722_v11 = vmul.f32 0.5, %v3455_v42 }
 0x69c   :  { %v1971_v52 = vmul.f32 %v1970_v58, %v1946_v18  ;;  %v1918_v55 = vmul.f32 %v2538_v23, %v3549_v4  ;;  %vm1923_vm7 = vweird.f32 %v2538_v23  ;;  %v2049_v4 = vor.u32 1.1754944e-38, %v2048_v56 }
 0x69d   :  { %v2005_v62 = vsel %vm2004_vm5, %v2536_v14, %v2001_v48  ;;  %v2540_v38 = vpop.eup %2539  ;;  %vm1924_vm9 = vmor %vm1922_vm8, %vm1923_vm7  ;;  %v1725_v47 = vmul.f32 0.5, %v3489_v32 }
 0x69e   :  { %v2381_v53 = vclamps-f32 %v1971_v52, 1.0  ;;  %v2010_v45 = vsel %vm2007_vm6, %v2009_v54, %v2005_v62  ;;  %v1919_v39 = vsub.f32 1.0, %v1918_v55  ;;  %v2038_v19 = vmul.f32 %v2540_v38, %v3554_v37 }
 0x69f   :  { %v2011_v15 = vmul.f32 %v2010_v45, %v1986_v27  ;;  %vm2043_vm10 = vweird.f32 %v2540_v38 }
 0x6a0   :  { %v2059_v22 = vadd.f32 1.0, %v2381_v53  ;;  %v1920_v6 = vmul.f32 %v2538_v23, %v1919_v39  ;;  %v2039_v2 = vsub.f32 1.0, %v2038_v19  ;;  %vm2044_vm13 = vmor %vm2042_vm12, %vm2043_vm10 }
 0x6a1   :  { %v2382_v17 = vclamps-f32 %v2011_v15, 1.0 }
 0x6a2   :  { %v2067_v0 = vmul.f32 %v2059_v22, %v1723_v1  ;;  %v1921_v21 = vadd.f32 %v2538_v23, %v1920_v6  ;;  %v2040_v24 = vmul.f32 %v2540_v38, %v2039_v2 }
 0x6a3   :  { %v2060_v49 = vadd.f32 1.0, %v2382_v17 }
 0x6a4   :  { %2180 = vmatmul.f32.gmra.mxu0 %v2067_v0  ;;  %v1925_v57 = vsel %vm1924_vm9, %v2538_v23, %v1921_v21  ;;  %v2041_v25 = vadd.f32 %v2540_v38, %v2040_v24 }
 0x6a5   :  { %v2068_v50 = vmul.f32 %v2060_v49, %v1724_v61  ;;  %v1930_v30 = vsel %vm1927_vm11, %v1929_v20, %v1925_v57 }
 0x6a6   :  { %v1931_v16 = vmul.f32 %v1930_v30, %v1906_v3  ;;  %v2045_v14 = vsel %vm2044_vm13, %v2540_v38, %v2041_v25 }
 0x6a7   :  { %2203 = vmatmul.f32.gmra.mxu1 %v2068_v50  ;;  %v2050_v44 = vsel %vm2047_vm14, %v2049_v4, %v2045_v14 }
 0x6a8   :  { %v2380_v10 = vclamps-f32 %v1931_v16, 1.0  ;;  %v2051_v18 = vmul.f32 %v2050_v44, %v2026_v8  ;;  %v2232_v44 = vld [vmem:[%s3603_s11] sm:$0xff]  ;;  %s2848_s11 = smov [#allocation19]  }
 0x6a9   :  { %s2308_s3 = sshll.u32 %s2848_s11, 4  ;;  %s2309_s3 = int_to_ptr.vmem [resolvable:$true] %s2308_s3 }
 0x6aa   :  { %v2058_v63 = vadd.f32 1.0, %v2380_v10  ;;  %v2383_v43 = vclamps-f32 %v2051_v18, 1.0 }
 0x6ac   :  { %v2066_v34 = vmul.f32 %v2058_v63, %v1722_v11  ;;  %v2061_v59 = vadd.f32 1.0, %v2383_v43  ;;  %v2233_v63 = vld [vmem:[#allocation17] sm:$0xff] }
 0x6ae   :  { %2157 = vmatmul.f32.gmra.mxu3 %v2066_v34  ;;  %v2069_v37 = vmul.f32 %v2061_v59, %v1725_v47 }
 0x6b0   :  { %2226 = vmatmul.f32.gmra.mxu2 %v2069_v37 }
 0x6f9   :  { %v2178_v36 = vpop.f32.mrf.mxu0 }
 0x6fa   :  { %v2201_v58 = vpop.f32.mrf.mxu1 }
 0x708   :  { %v2155_v33 = vpop.f32.mrf.mxu3 }
 0x709   :  { %v2156_v41 = vadd.f32 %v2454_v9, %v2155_v33 }
 0x70b   :  { %v2179_v60 = vadd.f32 %v2178_v36, %v2156_v41 }
 0x70d   :  { %v2202_v29 = vadd.f32 %v2201_v58, %v2179_v60  ;;  %v2224_v42 = vpop.f32.mrf.mxu2 }
 0x70f   :  { %v2225_v28 = vadd.f32 %v2224_v42, %v2202_v29 }
 0x711   :  { %v2230_v52 = vadd.f32 %v2225_v28, %v3260_v35 }
 0x713   :  { %2234 = vadd.xlane.f32.xlu0 %v2230_v52 }
 0x721   :  { %v2181_v40 = vpop.f32.mrf.mxu0 }
 0x724   :  { %v2204_v1 = vpop.f32.mrf.mxu1 }
 0x731   :  { %v2158_v32 = vpop.f32.mrf.mxu3 }
 0x732   :  { %v2159_v23 = vadd.f32 %v2454_v9, %v2158_v32 }
 0x733   :  { %v2227_v54 = vpop.f32.mrf.mxu2 }
 0x734   :  { %v2182_v48 = vadd.f32 %v2181_v40, %v2159_v23 }
 0x736   :  { %v2205_v53 = vadd.f32 %v2204_v1, %v2182_v48 }
 0x738   :  { %v2228_v55 = vadd.f32 %v2227_v54, %v2205_v53 }
 0x73a   :  { %v2231_v27 = vadd.f32 %v2228_v55, %v3267_v46 }
 0x73c   :  { %2236 = vadd.xlane.f32.xlu1 %v2231_v27 }
 0x786   :  { %v2235_v31 = vpop.xlane.xlu0 %2234 }
 0x787   :  { %v2238_v62 = vrot.slane %v2235_v31, 4 }
 0x789   :  { %v2239_v38 = vadd.f32 %v2238_v62, %v2235_v31 }
 0x78b   :  { %v2240_v22 = vrot.slane %v2239_v38, 2 }
 0x78d   :  { %v2241_v45 = vadd.f32 %v2240_v22, %v2239_v38 }
 0x78f   :  { %v2242_v39 = vrot.slane %v2241_v45, 1 }
 0x791   :  { %v2243_v13 = vadd.f32 %v2242_v39, %v2241_v45 }
 0x793   :  { %v2250_v35 = vmul.f32 %v2243_v13, %v3245_v51 }
 0x795   :  { %v2252_v7 = vsub.f32 %v2230_v52, %v2250_v35 }
 0x797   :  { %v2254_v15 = vmul.f32 %v2252_v7, %v2252_v7 }
 0x799   :  { %2256 = vadd.xlane.f32.xlu2 %v2254_v15 }
 0x7af   :  { %v2237_v19 = vpop.xlane.xlu1 %2236 }
 0x7b0   :  { %v2244_v0 = vrot.slane %v2237_v19, 4 }
 0x7b2   :  { %v2245_v6 = vadd.f32 %v2244_v0, %v2237_v19 }
 0x7b4   :  { %v2246_v12 = vrot.slane %v2245_v6, 2 }
 0x7b6   :  { %v2247_v61 = vadd.f32 %v2246_v12, %v2245_v6 }
 0x7b8   :  { %v2248_v5 = vrot.slane %v2247_v61, 1 }
 0x7ba   :  { %v2249_v46 = vadd.f32 %v2248_v5, %v2247_v61 }
 0x7bc   :  { %v2251_v17 = vmul.f32 %v2249_v46, %v3245_v51 }
 0x7be   :  { %v2253_v2 = vsub.f32 %v2231_v27, %v2251_v17 }
 0x7c0   :  { %v2255_v21 = vmul.f32 %v2253_v2, %v2253_v2 }
 0x7c2   :  { %2258 = vadd.xlane.f32.xlu0 %v2255_v21 }
 0x80c   :  { %v2257_v20 = vpop.xlane.xlu2 %2256 }
 0x80d   :  { %v2260_v56 = vrot.slane %v2257_v20, 4 }
 0x80f   :  { %v2261_v49 = vadd.f32 %v2260_v56, %v2257_v20 }
 0x811   :  { %v2262_v24 = vrot.slane %v2261_v49, 2 }
 0x813   :  { %v2263_v26 = vadd.f32 %v2262_v24, %v2261_v49 }
 0x815   :  { %v2264_v3 = vrot.slane %v2263_v26, 1 }
 0x817   :  { %v2265_v57 = vadd.f32 %v2264_v3, %v2263_v26 }
 0x819   :  { %v2272_v50 = vmul.f32 %v2265_v57, %v3245_v51 }
 0x81b   :  { %v2274_v30 = vadd.f32 1e-05, %v2272_v50 }
 0x81d   :  { %2541 = vrsqrt.f32 %v2274_v30  ;;  %vm2282_vm0 = vweird.f32 %v2274_v30 }
 0x823   :  { %v2542_v25 = vpop.eup %2541 }
 0x824   :  { %v2277_v16 = vmul.f32 %v2542_v25, %v2274_v30  ;;  %vm2283_vm15 = vweird.f32 %v2542_v25 }
 0x825   :  { %vm2284_vm1 = vmor %vm2282_vm0, %vm2283_vm15 }
 0x826   :  { %v2278_v4 = vmul.f32 %v2542_v25, %v2277_v16 }
 0x828   :  { %v2279_v8 = vmul.f32 0.5, %v2278_v4 }
 0x82a   :  { %v2280_v14 = vsub.f32 1.5, %v2279_v8 }
 0x82c   :  { %v2281_v10 = vmul.f32 %v2542_v25, %v2280_v14 }
 0x82e   :  { %v2285_v18 = vsel %vm2284_vm1, %v2542_v25, %v2281_v10 }
 0x82f   :  { %v2296_v11 = vmul.f32 %v2285_v18, %v2252_v7 }
 0x831   :  { %v2298_v43 = vmul.f32 %v2296_v11, %v2232_v44 }
 0x833   :  { %v2300_v34 = vadd.f32 %v2298_v43, %v2233_v63 }
 0x835   :  { %2302 = vst [vmem:[#allocation19] sm:$0xff] %v2300_v34  ;;  %v2259_v47 = vpop.xlane.xlu0 %2258 }
 0x836   :  { %v2266_v59 = vrot.slane %v2259_v47, 4 }
 0x838   :  { %v2267_v37 = vadd.f32 %v2266_v59, %v2259_v47 }
 0x83a   :  { %v2268_v9 = vrot.slane %v2267_v37, 2 }
 0x83c   :  { %v2269_v33 = vadd.f32 %v2268_v9, %v2267_v37 }
 0x83e   :  { %v2270_v41 = vrot.slane %v2269_v33, 1 }
 0x840   :  { %v2271_v36 = vadd.f32 %v2270_v41, %v2269_v33 }
 0x842   :  { %v2273_v60 = vmul.f32 %v2271_v36, %v3245_v51 }
 0x844   :  { %v2275_v58 = vadd.f32 1e-05, %v2273_v60 }
 0x846   :  { %2543 = vrsqrt.f32 %v2275_v58  ;;  %vm2292_vm3 = vweird.f32 %v2275_v58 }
 0x84c   :  { %v2544_v29 = vpop.eup %2543 }
 0x84d   :  { %v2287_v42 = vmul.f32 %v2544_v29, %v2275_v58  ;;  %vm2293_vm2 = vweird.f32 %v2544_v29 }
 0x84e   :  { %vm2294_vm4 = vmor %vm2292_vm3, %vm2293_vm2 }
 0x84f   :  { %v2288_v28 = vmul.f32 %v2544_v29, %v2287_v42 }
 0x851   :  { %v2289_v52 = vmul.f32 0.5, %v2288_v28 }
 0x853   :  { %v2290_v32 = vsub.f32 1.5, %v2289_v52 }
 0x855   :  { %v2291_v23 = vmul.f32 %v2544_v29, %v2290_v32 }
 0x857   :  { %v2295_v40 = vsel %vm2294_vm4, %v2544_v29, %v2291_v23 }
 0x858   :  { %v2297_v48 = vmul.f32 %v2295_v40, %v2253_v2 }
 0x85a   :  { %v2299_v51 = vmul.f32 %v2297_v48, %v2232_v44 }
 0x85c   :  { %v2301_v1 = vadd.f32 %v2299_v51, %v2233_v63 }
 0x85e   :  { %2303 = vst [vmem:[#allocation19 + $0x8] sm:$0xff] %v2301_v1 }
 0x85f   :  { %2316 = dma.vmem_to_hbm [thread:$0]  %s2309_s3, 256, %s2311_s29, [#allocation4], %s2829_s1, %s2829_s1, %s2830_s23  }
 0x860   :  { %2823 = dma.done.wait [#allocation4], 256  }
 0x861   :  { %2824 = vsyncadd [#allocation4], 4294967040 }
 0x862   :  { %2321 = vsyncpa [#allocation3], 1 }
 0x863   :  { %2322 = vsyncpa [#allocation6], 1 }
 0x864   :  { %2323 = vsyncpa [#allocation9], 1 }
 0x865   :  { %2324 = vsyncpa [#allocation12], 1 }
 0x866   :  { %2325 = vsyncpa [#allocation15], 1 }
 0x867   :  { %2326 = vsyncpa [#allocation18], 1 }
 0x868   :  { %2327 = vsyncpa [#allocation4], 1 }

</bundles_post_ra>
